<compile_context>
chip_gen: v5e
topology: v5e:2x2
jax: 0.10.0
libtpu: 0.0.40
codegen_flags: <defaults>
</compile_context>

<pallas_src>
import math
from functools import partial

import jax
import jax.numpy as jnp
from jax.experimental import pallas as pl
from jax.experimental.pallas import tpu as pltpu

_SQRT_HALF = 0.7071067811865476


# ------------------------- in-kernel helpers --------------------------------

def _erf(x):
    # Abramowitz & Stegun 7.1.26 polynomial (|err| < 1.5e-7): exact-erf GELU
    # lowers to one EUP exp plus VALU Horner work (hidden under the MXU slots).
    sign = jnp.where(x < 0.0, -1.0, 1.0)
    ax = jnp.abs(x)
    t = 1.0 / (1.0 + 0.3275911 * ax)
    poly = ((((1.061405429 * t - 1.453152027) * t + 1.421413741) * t
             - 0.284496736) * t + 0.254829592) * t
    return sign * (1.0 - poly * jnp.exp(-ax * ax))


def _gelu_exact(x):
    return 0.5 * x * (1.0 + _erf(x * _SQRT_HALF))


# ------------------------- Pallas kernel ------------------------------------

def classblock_kernel(x_ref, w1_ref, vecs_ref, w2_ref, b2_ref,
                      logits_ref, feature_ref):
    # vecs_ref rows: 0 = b1, 1 = BN scale, 2 = BN shift  (rows 3..7 padding)
    b1 = vecs_ref[0:1, :]
    scale = vecs_ref[1:2, :]
    shift = vecs_ref[2:3, :]

    # add_block: Linear -> GELU(exact) -> folded BatchNorm -> Dropout(eval=id)
    h = jnp.dot(x_ref[...], w1_ref[...],
                preferred_element_type=jnp.float32) + b1
    h = _gelu_exact(h)
    h = h * scale + shift
    feature_ref[...] = h

    # classifier: Linear(nb -> classes)
    logits_ref[...] = jnp.dot(h, w2_ref[...],
                              preferred_element_type=jnp.float32) + b2_ref[0:1, :]


# ------------------------- wrapper -------------------------------------------

def _vmem_spec():
    return pl.BlockSpec(memory_space=pltpu.MemorySpace.VMEM)


def _round_up(n, m):
    return ((n + m - 1) // m) * m


@partial(jax.jit, static_argnames=())
def classblock_forward(x, p):
    """Eval-mode ClassBlock.forward: returns (logits, feature)."""
    B, in_dim = x.shape
    nb = p["w1"].shape[1]
    classes = p["w2"].shape[1]

    # Pad batch to a multiple of 8 so every load/store is sublane-dense.
    Bp = max(8, _round_up(B, 8))
    x_pad = jnp.zeros((Bp, in_dim), jnp.float32).at[:B, :].set(x)

    # Fold BatchNorm (eval) into scale/shift once, outside the kernel, and
    # pack the three per-feature vectors into one (8, nb) slab -> one DMA.
    scale = p["gamma"] * jax.lax.rsqrt(p["rv"] + 1e-5)
    shift = p["beta"] - p["rm"] * scale
    vecs = jnp.zeros((8, nb), jnp.float32)
    vecs = vecs.at[0, :].set(p["b1"]).at[1, :].set(scale).at[2, :].set(shift)

    flops = 2 * Bp * in_dim * nb + 2 * Bp * nb * classes
    bytes_accessed = 4 * (Bp * in_dim + in_dim * nb + 8 * nb + nb * classes
                          + classes + Bp * nb + Bp * classes)

    logits, feature = pl.pallas_call(
        classblock_kernel,
        out_shape=(jax.ShapeDtypeStruct((Bp, classes), jnp.float32),
                   jax.ShapeDtypeStruct((Bp, nb), jnp.float32)),
        in_specs=[_vmem_spec()] * 5,
        out_specs=(_vmem_spec(), _vmem_spec()),
        cost_estimate=pl.CostEstimate(flops=flops, transcendentals=Bp * nb,
                                      bytes_accessed=bytes_accessed),
    )(x_pad, p["w1"], vecs, p["w2"], p["b2"].reshape(1, -1))

    # TODO(synk): Dropout(p=drop_rate) only matters in training mode; eval
    # forward (as implemented) is the identity.
    return logits[:B], feature[:B]


# ------------------------- params --------------------------------------------

def init_params(key, *, input_dim=1024, classes=128, bottleneck=512):
    ks = jax.random.split(key, 3)
    # add_block Linear: kaiming_normal(a=0, mode='fan_out') -> std = sqrt(2/out)
    w1 = jax.random.normal(ks[0], (input_dim, bottleneck), jnp.float32) \
        * math.sqrt(2.0 / bottleneck)
    b1 = jnp.zeros((bottleneck,), jnp.float32)
    # BatchNorm1d: weight ~ N(1, 0.02), bias 0, running stats (0, 1)
    gamma = 1.0 + 0.02 * jax.random.normal(ks[1], (bottleneck,), jnp.float32)
    beta = jnp.zeros((bottleneck,), jnp.float32)
    rm = jnp.zeros((bottleneck,), jnp.float32)
    rv = jnp.ones((bottleneck,), jnp.float32)
    # classifier Linear: weight ~ N(0, 0.001), bias 0
    w2 = 0.001 * jax.random.normal(ks[2], (bottleneck, classes), jnp.float32)
    b2 = jnp.zeros((classes,), jnp.float32)
    return dict(w1=w1, b1=b1, gamma=gamma, beta=beta, rm=rm, rv=rv,
                w2=w2, b2=b2)


# ------------------------- pure-JAX reference --------------------------------

def reference(x, p):
    h = x @ p["w1"] + p["b1"]
    h = jax.nn.gelu(h, approximate=False)
    h = (h - p["rm"]) / jnp.sqrt(p["rv"] + 1e-5) * p["gamma"] + p["beta"]
    logits = h @ p["w2"] + p["b2"]
    return logits, h


# ------------------------- main -----------------------------------------------

if __name__ == "__main__":
    key = jax.random.PRNGKey(0)
    kp, kx = jax.random.split(key, 2)

    INPUT_DIM, CLASSES, BOTTLENECK = 1024, 128, 512
    params = init_params(kp, input_dim=INPUT_DIM, classes=CLASSES,
                         bottleneck=BOTTLENECK)

    # ClassBlock consumes a (batch, input_dim) feature matrix.
    x = jax.random.normal(kx, (2, INPUT_DIM), jnp.float32)

    logits, feature = jax.block_until_ready(classblock_forward(x, params))

    # sanity check against plain JAX
    ref_logits, ref_feature = reference(x, params)
    assert logits.shape == (2, CLASSES) and feature.shape == (2, BOTTLENECK)
    assert jnp.allclose(feature, ref_feature, atol=1e-4), \
        float(jnp.max(jnp.abs(feature - ref_feature)))
    assert jnp.allclose(logits, ref_logits, atol=1e-4), \
        float(jnp.max(jnp.abs(logits - ref_logits)))

    print("KERNEL_OK")
</pallas_src>

<mosaic_0001>
module attributes {stable_mosaic.version = 11 : i64} {
  func.func @classblock_kernel(%arg0: memref<8x1024xf32, #tpu.memory_space<vmem>>, %arg1: memref<1024x512xf32, #tpu.memory_space<vmem>>, %arg2: memref<8x512xf32, #tpu.memory_space<vmem>>, %arg3: memref<512x128xf32, #tpu.memory_space<vmem>>, %arg4: memref<1x128xf32, #tpu.memory_space<vmem>>, %arg5: memref<8x128xf32, #tpu.memory_space<vmem>>, %arg6: memref<8x512xf32, #tpu.memory_space<vmem>>) attributes {dimension_semantics = [], scalar_prefetch = 0 : i64, scratch_operands = 0 : i64, tpu.core_type = #tpu.core_type<tc>} {
    %c0 = arith.constant 0 : index
    %c0_0 = arith.constant 0 : index
    %0 = vector.load %arg2[%c0, %c0_0] : memref<8x512xf32, #tpu.memory_space<vmem>>, vector<1x512xf32>
    %c1 = arith.constant 1 : index
    %c0_1 = arith.constant 0 : index
    %1 = vector.load %arg2[%c1, %c0_1] : memref<8x512xf32, #tpu.memory_space<vmem>>, vector<1x512xf32>
    %c2 = arith.constant 2 : index
    %c0_2 = arith.constant 0 : index
    %2 = vector.load %arg2[%c2, %c0_2] : memref<8x512xf32, #tpu.memory_space<vmem>>, vector<1x512xf32>
    %c0_3 = arith.constant 0 : index
    %c0_4 = arith.constant 0 : index
    %3 = vector.load %arg0[%c0_3, %c0_4] : memref<8x1024xf32, #tpu.memory_space<vmem>>, vector<8x1024xf32>
    %c0_5 = arith.constant 0 : index
    %c0_6 = arith.constant 0 : index
    %4 = vector.load %arg1[%c0_5, %c0_6] : memref<1024x512xf32, #tpu.memory_space<vmem>>, vector<1024x512xf32>
    %cst = arith.constant dense<0.000000e+00> : vector<8x512xf32>
    %5 = tpu.matmul %3, %4, %cst {dimension_numbers = #tpu.dot_dimension_numbers<[1], [0], [0], [1], [0, 0, 1, 1], [], []>} : vector<8x1024xf32>, vector<1024x512xf32>, vector<8x512xf32> -> vector<8x512xf32>
    %6 = vector.broadcast %0 : vector<1x512xf32> to vector<8x512xf32>
    %7 = arith.addf %5, %6 : vector<8x512xf32>
    %cst_7 = arith.constant 5.000000e-01 : f32
    %8 = vector.broadcast %cst_7 : f32 to vector<8x512xf32>
    %9 = arith.mulf %8, %7 : vector<8x512xf32>
    %cst_8 = arith.constant 0.707106769 : f32
    %10 = vector.broadcast %cst_8 : f32 to vector<8x512xf32>
    %11 = arith.mulf %7, %10 : vector<8x512xf32>
    %cst_9 = arith.constant 0.000000e+00 : f32
    %12 = vector.broadcast %cst_9 : f32 to vector<8x512xf32>
    %13 = arith.cmpf olt, %11, %12 : vector<8x512xf32>
    %cst_10 = arith.constant -1.000000e+00 : f32
    %cst_11 = arith.constant 1.000000e+00 : f32
    %14 = vector.broadcast %cst_10 : f32 to vector<8x512xf32>
    %15 = vector.broadcast %cst_11 : f32 to vector<8x512xf32>
    %16 = arith.select %13, %14, %15 : vector<8x512xi1>, vector<8x512xf32>
    %17 = math.absf %11 : vector<8x512xf32>
    %cst_12 = arith.constant 0.327591091 : f32
    %18 = vector.broadcast %cst_12 : f32 to vector<8x512xf32>
    %19 = arith.mulf %18, %17 : vector<8x512xf32>
    %cst_13 = arith.constant 1.000000e+00 : f32
    %20 = vector.broadcast %cst_13 : f32 to vector<8x512xf32>
    %21 = arith.addf %20, %19 : vector<8x512xf32>
    %cst_14 = arith.constant 1.000000e+00 : f32
    %22 = vector.broadcast %cst_14 : f32 to vector<8x512xf32>
    %23 = arith.divf %22, %21 : vector<8x512xf32>
    %cst_15 = arith.constant 1.06140542 : f32
    %24 = vector.broadcast %cst_15 : f32 to vector<8x512xf32>
    %25 = arith.mulf %24, %23 : vector<8x512xf32>
    %cst_16 = arith.constant 1.45315206 : f32
    %26 = vector.broadcast %cst_16 : f32 to vector<8x512xf32>
    %27 = arith.subf %25, %26 : vector<8x512xf32>
    %28 = arith.mulf %27, %23 : vector<8x512xf32>
    %cst_17 = arith.constant 1.42141378 : f32
    %29 = vector.broadcast %cst_17 : f32 to vector<8x512xf32>
    %30 = arith.addf %28, %29 : vector<8x512xf32>
    %31 = arith.mulf %30, %23 : vector<8x512xf32>
    %cst_18 = arith.constant 0.284496725 : f32
    %32 = vector.broadcast %cst_18 : f32 to vector<8x512xf32>
    %33 = arith.subf %31, %32 : vector<8x512xf32>
    %34 = arith.mulf %33, %23 : vector<8x512xf32>
    %cst_19 = arith.constant 0.254829586 : f32
    %35 = vector.broadcast %cst_19 : f32 to vector<8x512xf32>
    %36 = arith.addf %34, %35 : vector<8x512xf32>
    %37 = arith.mulf %36, %23 : vector<8x512xf32>
    %cst_20 = arith.constant 0.000000e+00 : f32
    %38 = vector.broadcast %cst_20 : f32 to vector<8x512xf32>
    %39 = arith.subf %38, %17 : vector<8x512xf32>
    %40 = arith.mulf %39, %17 : vector<8x512xf32>
    %41 = math.exp %40 : vector<8x512xf32>
    %42 = arith.mulf %37, %41 : vector<8x512xf32>
    %cst_21 = arith.constant 1.000000e+00 : f32
    %43 = vector.broadcast %cst_21 : f32 to vector<8x512xf32>
    %44 = arith.subf %43, %42 : vector<8x512xf32>
    %45 = arith.mulf %16, %44 : vector<8x512xf32>
    %cst_22 = arith.constant 1.000000e+00 : f32
    %46 = vector.broadcast %cst_22 : f32 to vector<8x512xf32>
    %47 = arith.addf %46, %45 : vector<8x512xf32>
    %48 = arith.mulf %9, %47 : vector<8x512xf32>
    %49 = vector.broadcast %1 : vector<1x512xf32> to vector<8x512xf32>
    %50 = arith.mulf %48, %49 : vector<8x512xf32>
    %51 = vector.broadcast %2 : vector<1x512xf32> to vector<8x512xf32>
    %52 = arith.addf %50, %51 : vector<8x512xf32>
    %c0_23 = arith.constant 0 : index
    %c0_24 = arith.constant 0 : index
    %53 = vector.load %arg6[%c0_23, %c0_24] : memref<8x512xf32, #tpu.memory_space<vmem>>, vector<8x512xf32>
    tpu.vector_store %arg6[%c0_23, %c0_24], %52 {strides = array<i32>} : memref<8x512xf32, #tpu.memory_space<vmem>>, vector<8x512xf32>,
    %c0_25 = arith.constant 0 : index
    %c0_26 = arith.constant 0 : index
    %54 = vector.load %arg3[%c0_25, %c0_26] : memref<512x128xf32, #tpu.memory_space<vmem>>, vector<512x128xf32>
    %cst_27 = arith.constant dense<0.000000e+00> : vector<8x128xf32>
    %55 = tpu.matmul %52, %54, %cst_27 {dimension_numbers = #tpu.dot_dimension_numbers<[1], [0], [0], [1], [0, 0, 1, 1], [], []>} : vector<8x512xf32>, vector<512x128xf32>, vector<8x128xf32> -> vector<8x128xf32>
    %c0_28 = arith.constant 0 : index
    %c0_29 = arith.constant 0 : index
    %56 = vector.load %arg4[%c0_28, %c0_29] : memref<1x128xf32, #tpu.memory_space<vmem>>, vector<1x128xf32>
    %57 = vector.broadcast %56 : vector<1x128xf32> to vector<8x128xf32>
    %58 = arith.addf %55, %57 : vector<8x128xf32>
    %c0_30 = arith.constant 0 : index
    %c0_31 = arith.constant 0 : index
    %59 = vector.load %arg5[%c0_30, %c0_31] : memref<8x128xf32, #tpu.memory_space<vmem>>, vector<8x128xf32>
    tpu.vector_store %arg5[%c0_30, %c0_31], %58 {strides = array<i32>} : memref<8x128xf32, #tpu.memory_space<vmem>>, vector<8x128xf32>,
    return
  }
}

</mosaic_0001>

<bundles_post_ra>
// kernel: classblock_forward.1
= control target key start
LH: loop header
LB: loop body
LE: loop exit
PB: predicated region body
PF: predicated region fallthrough
CT: control target
= control target key end

     0   :  { %12 = vsyncpa [#allocation3], 0  ;;  %s1990_s0 = inlined_call_operand.vmem [shape: f32[8,1024], index: 0, kind: input, shape index: {}]   ;;  %s1991_s1 = inlined_call_operand.hbm [shape: f32[1024,512], index: 1, kind: input, shape index: {}]   ;;  %s1992_s2 = inlined_call_operand.vmem [shape: f32[8,512], index: 2, kind: input, shape index: {}]   ;;  %s1993_s3 = inlined_call_operand.hbm [shape: f32[512,128], index: 3, kind: input, shape index: {}]   ;;  %s1994_s4 = inlined_call_operand.hbm [shape: f32[1,128], index: 4, kind: input, shape index: {}]   ;;  %s1995_s5 = inlined_call_operand.vmem [shape: f32[8,128], index: 5, kind: output, shape index: {0}]   ;;  %s1996_s6 = inlined_call_operand.vmem [shape: f32[8,512], index: 6, kind: output, shape index: {1}]  }
   0x1   :  { %13 = vsyncpa [#allocation5], 0  ;;  %s35_s23 = sshll.u32 %s1993_s3, 4  ;;  %s1710_s24 = smov [#allocation4]   ;;  %s36_s23 = int_to_ptr.hbm [resolvable:$true] %s35_s23 }
   0x2   :  { %s37_s25 = sshll.u32 %s1710_s24, 4  ;;  %s20_s28 = sshll.u32 %s1991_s1, 4  ;;  %s38_s25 = int_to_ptr.vmem [resolvable:$true] %s37_s25  ;;  %s21_s28 = int_to_ptr.hbm [resolvable:$true] %s20_s28 }
   0x3   :  { %s1711_s29 = smov 128   ;;  %s1712_s30 = smov 8  }
   0x4   :  { %43 = dma.hbm_to_vmem [thread:$0]  %s36_s23, 8192, %s38_s25, [#allocation5], %s1711_s29, %s1711_s29, %s1712_s30  }
   0x5   :  { %s1713_s7 = smov [#allocation2]   ;;  %s1714_s9 = smov 512  }
   0x6   :  { %s22_s8 = sshll.u32 %s1713_s7, 4  ;;  %s1715_s10 = smov 32   ;;  %s23_s8 = int_to_ptr.vmem [resolvable:$true] %s22_s8 }
   0x7   :  { %28 = dma.hbm_to_vmem [thread:$0]  %s21_s28, 65536, %s23_s8, [#allocation3], %s1714_s9, %s1714_s9, %s1715_s10  }
   0x8   :  { %s49_s12 = sshll.u32 %s1994_s4, 4  ;;  %s1716_s13 = smov [#allocation6]   ;;  %s50_s12 = int_to_ptr.hbm [resolvable:$true] %s49_s12 }
   0x9   :  { %s51_s14 = sshll.u32 %s1716_s13, 4  ;;  %s52_s14 = int_to_ptr.vmem [resolvable:$true] %s51_s14 }
   0xa   :  { %54 = dma.hbm_to_vmem [thread:$0]  %s50_s12, 16, %s52_s14, [#allocation5]  }
   0xb   :  { %1706 = dma.done.wait [#allocation3], 65536  }
   0xc   :  { %1707 = vsyncadd [#allocation3], 4294901760 }
   0xd   :  { %1708 = dma.done.wait [#allocation5], 8208  }
   0xe   :  { %1709 = vsyncadd [#allocation5], 4294959088  ;;  %v140_v0 = vld [vmem:[#allocation2 + $0x1e0] sm:$0xff] }
   0xf   :  { %v268_v1 = vld [vmem:[#allocation2 + $0x5e0] sm:$0xff]  ;;  %601 = vmatpush.msra.mxu0 %v140_v0 }
  0x10   :  { %v136_v2 = vld [vmem:[#allocation2 + $0x1c0] sm:$0xff]  ;;  %641 = vmatpush.msra.mxu2 %v268_v1 }
  0x11   :  { %v264_v3 = vld [vmem:[#allocation2 + $0x5c0] sm:$0xff]  ;;  %602 = vmatpush.msra.mxu0 %v136_v2 }
  0x12   :  { %v332_v4 = vld [vmem:[#allocation2 + $0x7e0] sm:$0xff]  ;;  %642 = vmatpush.msra.mxu2 %v264_v3 }
  0x13   :  { %v132_v5 = vld [vmem:[#allocation2 + $0x1a0] sm:$0xff]  ;;  %661 = vmatpush.msra.mxu3 %v332_v4 }
  0x14   :  { %v204_v6 = vld [vmem:[#allocation2 + $0x3e0] sm:$0xff]  ;;  %603 = vmatpush.msra.mxu0 %v132_v5 }
  0x15   :  { %v260_v7 = vld [vmem:[#allocation2 + $0x5a0] sm:$0xff]  ;;  %621 = vmatpush.msra.mxu1 %v204_v6 }
  0x16   :  { %v328_v8 = vld [vmem:[#allocation2 + $0x7c0] sm:$0xff]  ;;  %643 = vmatpush.msra.mxu2 %v260_v7 }
  0x17   :  { %v200_v9 = vld [vmem:[#allocation2 + $0x3c0] sm:$0xff]  ;;  %662 = vmatpush.msra.mxu3 %v328_v8 }
  0x18   :  { %v128_v10 = vld [vmem:[#allocation2 + $0x180] sm:$0xff]  ;;  %622 = vmatpush.msra.mxu1 %v200_v9 }
  0x19   :  { %v256_v11 = vld [vmem:[#allocation2 + $0x580] sm:$0xff]  ;;  %604 = vmatpush.msra.mxu0 %v128_v10 }
  0x1a   :  { %v324_v12 = vld [vmem:[#allocation2 + $0x7a0] sm:$0xff]  ;;  %644 = vmatpush.msra.mxu2 %v256_v11 }
  0x1b   :  { %v196_v13 = vld [vmem:[#allocation2 + $0x3a0] sm:$0xff]  ;;  %663 = vmatpush.msra.mxu3 %v324_v12 }
  0x1c   :  { %v320_v14 = vld [vmem:[#allocation2 + $0x780] sm:$0xff]  ;;  %623 = vmatpush.msra.mxu1 %v196_v13 }
  0x1d   :  { %v124_v15 = vld [vmem:[#allocation2 + $0x160] sm:$0xff]  ;;  %664 = vmatpush.msra.mxu3 %v320_v14 }
  0x1e   :  { %v252_v16 = vld [vmem:[#allocation2 + $0x560] sm:$0xff]  ;;  %605 = vmatpush.msra.mxu0 %v124_v15 }
  0x1f   :  { %v192_v17 = vld [vmem:[#allocation2 + $0x380] sm:$0xff]  ;;  %645 = vmatpush.msra.mxu2 %v252_v16 }
  0x20   :  { %v316_v18 = vld [vmem:[#allocation2 + $0x760] sm:$0xff]  ;;  %624 = vmatpush.msra.mxu1 %v192_v17 }
  0x21   :  { %v120_v19 = vld [vmem:[#allocation2 + $0x140] sm:$0xff]  ;;  %665 = vmatpush.msra.mxu3 %v316_v18 }
  0x22   :  { %v248_v20 = vld [vmem:[#allocation2 + $0x540] sm:$0xff]  ;;  %606 = vmatpush.msra.mxu0 %v120_v19 }
  0x23   :  { %v188_v21 = vld [vmem:[#allocation2 + $0x360] sm:$0xff]  ;;  %646 = vmatpush.msra.mxu2 %v248_v20 }
  0x24   :  { %v312_v22 = vld [vmem:[#allocation2 + $0x740] sm:$0xff]  ;;  %625 = vmatpush.msra.mxu1 %v188_v21 }
  0x25   :  { %v116_v23 = vld [vmem:[#allocation2 + $0x120] sm:$0xff]  ;;  %666 = vmatpush.msra.mxu3 %v312_v22 }
  0x26   :  { %v244_v24 = vld [vmem:[#allocation2 + $0x520] sm:$0xff]  ;;  %607 = vmatpush.msra.mxu0 %v116_v23 }
  0x27   :  { %v184_v25 = vld [vmem:[#allocation2 + $0x340] sm:$0xff]  ;;  %647 = vmatpush.msra.mxu2 %v244_v24 }
  0x28   :  { %v308_v26 = vld [vmem:[#allocation2 + $0x720] sm:$0xff]  ;;  %626 = vmatpush.msra.mxu1 %v184_v25 }
  0x29   :  { %v112_v27 = vld [vmem:[#allocation2 + $0x100] sm:$0xff]  ;;  %667 = vmatpush.msra.mxu3 %v308_v26 }
  0x2a   :  { %v240_v28 = vld [vmem:[#allocation2 + $0x500] sm:$0xff]  ;;  %608 = vmatpush.msra.mxu0 %v112_v27 }
  0x2b   :  { %v180_v29 = vld [vmem:[#allocation2 + $0x320] sm:$0xff]  ;;  %648 = vmatpush.msra.mxu2 %v240_v28 }
  0x2c   :  { %v304_v30 = vld [vmem:[#allocation2 + $0x700] sm:$0xff]  ;;  %627 = vmatpush.msra.mxu1 %v180_v29 }
  0x2d   :  { %v108_v31 = vld [vmem:[#allocation2 + $0xe0] sm:$0xff]  ;;  %668 = vmatpush.msra.mxu3 %v304_v30 }
  0x2e   :  { %v236_v32 = vld [vmem:[#allocation2 + $0x4e0] sm:$0xff]  ;;  %609 = vmatpush.msra.mxu0 %v108_v31 }
  0x2f   :  { %v176_v33 = vld [vmem:[#allocation2 + $0x300] sm:$0xff]  ;;  %649 = vmatpush.msra.mxu2 %v236_v32 }
  0x30   :  { %v300_v34 = vld [vmem:[#allocation2 + $0x6e0] sm:$0xff]  ;;  %628 = vmatpush.msra.mxu1 %v176_v33 }
  0x31   :  { %v104_v35 = vld [vmem:[#allocation2 + $0xc0] sm:$0xff]  ;;  %669 = vmatpush.msra.mxu3 %v300_v34 }
  0x32   :  { %v232_v36 = vld [vmem:[#allocation2 + $0x4c0] sm:$0xff]  ;;  %610 = vmatpush.msra.mxu0 %v104_v35 }
  0x33   :  { %v172_v37 = vld [vmem:[#allocation2 + $0x2e0] sm:$0xff]  ;;  %650 = vmatpush.msra.mxu2 %v232_v36 }
  0x34   :  { %v296_v38 = vld [vmem:[#allocation2 + $0x6c0] sm:$0xff]  ;;  %629 = vmatpush.msra.mxu1 %v172_v37 }
  0x35   :  { %v100_v39 = vld [vmem:[#allocation2 + $0xa0] sm:$0xff]  ;;  %670 = vmatpush.msra.mxu3 %v296_v38 }
  0x36   :  { %v228_v40 = vld [vmem:[#allocation2 + $0x4a0] sm:$0xff]  ;;  %611 = vmatpush.msra.mxu0 %v100_v39 }
  0x37   :  { %v168_v41 = vld [vmem:[#allocation2 + $0x2c0] sm:$0xff]  ;;  %651 = vmatpush.msra.mxu2 %v228_v40 }
  0x38   :  { %v292_v42 = vld [vmem:[#allocation2 + $0x6a0] sm:$0xff]  ;;  %630 = vmatpush.msra.mxu1 %v168_v41 }
  0x39   :  { %v96_v43 = vld [vmem:[#allocation2 + $0x80] sm:$0xff]  ;;  %671 = vmatpush.msra.mxu3 %v292_v42 }
  0x3a   :  { %v224_v44 = vld [vmem:[#allocation2 + $0x480] sm:$0xff]  ;;  %612 = vmatpush.msra.mxu0 %v96_v43 }
  0x3b   :  { %v164_v45 = vld [vmem:[#allocation2 + $0x2a0] sm:$0xff]  ;;  %652 = vmatpush.msra.mxu2 %v224_v44 }
  0x3c   :  { %v288_v46 = vld [vmem:[#allocation2 + $0x680] sm:$0xff]  ;;  %631 = vmatpush.msra.mxu1 %v164_v45  ;;  %v1765_v45 = vld [vmem:[%s1990_s0 + $0x10] sm:$0xff] }
  0x3d   :  { %v92_v47 = vld [vmem:[#allocation2 + $0x60] sm:$0xff]  ;;  %672 = vmatpush.msra.mxu3 %v288_v46 }
  0x3e   :  { %v220_v48 = vld [vmem:[#allocation2 + $0x460] sm:$0xff]  ;;  %613 = vmatpush.msra.mxu0 %v92_v47 }
  0x3f   :  { %v160_v49 = vld [vmem:[#allocation2 + $0x280] sm:$0xff]  ;;  %653 = vmatpush.msra.mxu2 %v220_v48 }
  0x40   :  { %v284_v50 = vld [vmem:[#allocation2 + $0x660] sm:$0xff]  ;;  %632 = vmatpush.msra.mxu1 %v160_v49 }
  0x41   :  { %v88_v51 = vld [vmem:[#allocation2 + $0x40] sm:$0xff]  ;;  %673 = vmatpush.msra.mxu3 %v284_v50 }
  0x42   :  { %v216_v52 = vld [vmem:[#allocation2 + $0x440] sm:$0xff]  ;;  %614 = vmatpush.msra.mxu0 %v88_v51  ;;  %v1776_v51 = vld [vmem:[%s1990_s0 + $0x18] sm:$0xff] }
  0x43   :  { %v156_v53 = vld [vmem:[#allocation2 + $0x260] sm:$0xff]  ;;  %654 = vmatpush.msra.mxu2 %v216_v52 }
  0x44   :  { %v280_v54 = vld [vmem:[#allocation2 + $0x640] sm:$0xff]  ;;  %633 = vmatpush.msra.mxu1 %v156_v53 }
  0x45   :  { %v84_v55 = vld [vmem:[#allocation2 + $0x20] sm:$0xff]  ;;  %674 = vmatpush.msra.mxu3 %v280_v54 }
  0x46   :  { %v212_v56 = vld [vmem:[#allocation2 + $0x420] sm:$0xff]  ;;  %615 = vmatpush.msra.mxu0 %v84_v55 }
  0x47   :  { %v152_v57 = vld [vmem:[#allocation2 + $0x240] sm:$0xff]  ;;  %655 = vmatpush.msra.mxu2 %v212_v56  ;;  %v1782_v56 = vld [vmem:[%s1990_s0 + $0x8] sm:$0xff] }
  0x48   :  { %v276_v58 = vld [vmem:[#allocation2 + $0x620] sm:$0xff]  ;;  %634 = vmatpush.msra.mxu1 %v152_v57 }
  0x49   :  { %v80_v59 = vld [vmem:[#allocation2] sm:$0xff]  ;;  %675 = vmatpush.msra.mxu3 %v276_v58 }
  0x4a   :  { %v208_v60 = vld [vmem:[#allocation2 + $0x400] sm:$0xff]  ;;  %616 = vmatpush.msra.mxu0 %v80_v59 }
  0x4b   :  { %v396_v61 = vld [vmem:[#allocation2 + $0x9e0] sm:$0xff]  ;;  %656 = vmatpush.msra.mxu2 %v208_v60 }
  0x4c   :  { %v524_v62 = vld [vmem:[#allocation2 + $0xde0] sm:$0xff]  ;;  %681 = vmatpush.msrb.mxu0 %v396_v61  ;;  %657 = vmatmul.f32.vlgmr.msra.gmra.mxu2 %v1765_v45 }
  0x4d   :  { %v148_v63 = vld [vmem:[#allocation2 + $0x220] sm:$0xff]  ;;  %721 = vmatpush.msrb.mxu2 %v524_v62 }
  0x4e   :  { %v272_v0 = vld [vmem:[#allocation2 + $0x600] sm:$0xff]  ;;  %635 = vmatpush.msra.mxu1 %v148_v63 }
  0x4f   :  { %v392_v1 = vld [vmem:[#allocation2 + $0x9c0] sm:$0xff]  ;;  %676 = vmatpush.msra.mxu3 %v272_v0 }
  0x50   :  { %v520_v2 = vld [vmem:[#allocation2 + $0xdc0] sm:$0xff]  ;;  %682 = vmatpush.msrb.mxu0 %v392_v1  ;;  %677 = vmatmul.f32.vlgmr.msra.gmra.mxu3 %v1776_v51  ;;  %v1789_v1 = vld [vmem:[%s1990_s0 + $0x30] sm:$0xff] }
  0x51   :  { %v588_v3 = vld [vmem:[#allocation2 + $0xfe0] sm:$0xff]  ;;  %722 = vmatpush.msrb.mxu2 %v520_v2  ;;  %v141_v2 = vld [vmem:[#allocation2 + $0x1e8] sm:$0xff] }
  0x52   :  { %v144_v4 = vld [vmem:[#allocation2 + $0x200] sm:$0xff]  ;;  %741 = vmatpush.msrb.mxu3 %v588_v3  ;;  %v269_v3 = vld [vmem:[#allocation2 + $0x5e8] sm:$0xff] }
  0x53   :  { %v388_v5 = vld [vmem:[#allocation2 + $0x9a0] sm:$0xff]  ;;  %636 = vmatpush.msra.mxu1 %v144_v4 }
  0x54   :  { %v460_v6 = vld [vmem:[#allocation2 + $0xbe0] sm:$0xff]  ;;  %683 = vmatpush.msrb.mxu0 %v388_v5  ;;  %637 = vmatmul.f32.vlgmr.msra.gmra.mxu1 %v1782_v56 }
  0x55   :  { %v516_v7 = vld [vmem:[#allocation2 + $0xda0] sm:$0xff]  ;;  %701 = vmatpush.msrb.mxu1 %v460_v6 }
  0x56   :  { %v584_v8 = vld [vmem:[#allocation2 + $0xfc0] sm:$0xff]  ;;  %723 = vmatpush.msrb.mxu2 %v516_v7  ;;  %v1800_v7 = vld [vmem:[%s1990_s0 + $0x38] sm:$0xff] }
  0x57   :  { %v384_v9 = vld [vmem:[#allocation2 + $0x980] sm:$0xff]  ;;  %742 = vmatpush.msrb.mxu3 %v584_v8  ;;  %v137_v8 = vld [vmem:[#allocation2 + $0x1c8] sm:$0xff] }
  0x58   :  { %v456_v10 = vld [vmem:[#allocation2 + $0xbc0] sm:$0xff]  ;;  %684 = vmatpush.msrb.mxu0 %v384_v9  ;;  %v265_v9 = vld [vmem:[#allocation2 + $0x5c8] sm:$0xff] }
  0x59   :  { %v512_v11 = vld [vmem:[#allocation2 + $0xd80] sm:$0xff]  ;;  %702 = vmatpush.msrb.mxu1 %v456_v10  ;;  %v333_v10 = vld [vmem:[#allocation2 + $0x7e8] sm:$0xff] }
  0x5a   :  { %v580_v12 = vld [vmem:[#allocation2 + $0xfa0] sm:$0xff]  ;;  %724 = vmatpush.msrb.mxu2 %v512_v11 }
  0x5b   :  { %v380_v13 = vld [vmem:[#allocation2 + $0x960] sm:$0xff]  ;;  %743 = vmatpush.msrb.mxu3 %v580_v12  ;;  %v133_v12 = vld [vmem:[#allocation2 + $0x1a8] sm:$0xff] }
  0x5c   :  { %v452_v14 = vld [vmem:[#allocation2 + $0xba0] sm:$0xff]  ;;  %685 = vmatpush.msrb.mxu0 %v380_v13  ;;  %v1807_v13 = vld [vmem:[%s1990_s0 + $0x28] sm:$0xff] }
  0x5d   :  { %v508_v15 = vld [vmem:[#allocation2 + $0xd60] sm:$0xff]  ;;  %703 = vmatpush.msrb.mxu1 %v452_v14  ;;  %v261_v14 = vld [vmem:[#allocation2 + $0x5a8] sm:$0xff] }
  0x5e   :  { %v576_v16 = vld [vmem:[#allocation2 + $0xf80] sm:$0xff]  ;;  %725 = vmatpush.msrb.mxu2 %v508_v15  ;;  %v205_v15 = vld [vmem:[#allocation2 + $0x3e8] sm:$0xff] }
  0x5f   :  { %v376_v17 = vld [vmem:[#allocation2 + $0x940] sm:$0xff]  ;;  %744 = vmatpush.msrb.mxu3 %v576_v16  ;;  %v329_v16 = vld [vmem:[#allocation2 + $0x7c8] sm:$0xff] }
  0x60   :  { %v448_v18 = vld [vmem:[#allocation2 + $0xb80] sm:$0xff]  ;;  %686 = vmatpush.msrb.mxu0 %v376_v17  ;;  %v129_v17 = vld [vmem:[#allocation2 + $0x188] sm:$0xff] }
  0x61   :  { %v504_v19 = vld [vmem:[#allocation2 + $0xd40] sm:$0xff]  ;;  %704 = vmatpush.msrb.mxu1 %v448_v18  ;;  %v257_v18 = vld [vmem:[#allocation2 + $0x588] sm:$0xff] }
  0x62   :  { %v572_v20 = vld [vmem:[#allocation2 + $0xf60] sm:$0xff]  ;;  %726 = vmatpush.msrb.mxu2 %v504_v19  ;;  %v201_v19 = vld [vmem:[#allocation2 + $0x3c8] sm:$0xff] }
  0x63   :  { %v372_v21 = vld [vmem:[#allocation2 + $0x920] sm:$0xff]  ;;  %745 = vmatpush.msrb.mxu3 %v572_v20  ;;  %v325_v20 = vld [vmem:[#allocation2 + $0x7a8] sm:$0xff] }
  0x64   :  { %v444_v22 = vld [vmem:[#allocation2 + $0xb60] sm:$0xff]  ;;  %687 = vmatpush.msrb.mxu0 %v372_v21  ;;  %v125_v21 = vld [vmem:[#allocation2 + $0x168] sm:$0xff] }
  0x65   :  { %v500_v23 = vld [vmem:[#allocation2 + $0xd20] sm:$0xff]  ;;  %705 = vmatpush.msrb.mxu1 %v444_v22  ;;  %v253_v22 = vld [vmem:[#allocation2 + $0x568] sm:$0xff] }
  0x66   :  { %v568_v24 = vld [vmem:[#allocation2 + $0xf40] sm:$0xff]  ;;  %727 = vmatpush.msrb.mxu2 %v500_v23  ;;  %v197_v23 = vld [vmem:[#allocation2 + $0x3a8] sm:$0xff] }
  0x67   :  { %v368_v25 = vld [vmem:[#allocation2 + $0x900] sm:$0xff]  ;;  %746 = vmatpush.msrb.mxu3 %v568_v24  ;;  %v321_v24 = vld [vmem:[#allocation2 + $0x788] sm:$0xff] }
  0x68   :  { %v440_v26 = vld [vmem:[#allocation2 + $0xb40] sm:$0xff]  ;;  %688 = vmatpush.msrb.mxu0 %v368_v25  ;;  %v121_v25 = vld [vmem:[#allocation2 + $0x148] sm:$0xff] }
  0x69   :  { %v496_v27 = vld [vmem:[#allocation2 + $0xd00] sm:$0xff]  ;;  %706 = vmatpush.msrb.mxu1 %v440_v26  ;;  %v249_v26 = vld [vmem:[#allocation2 + $0x548] sm:$0xff] }
  0x6a   :  { %v564_v28 = vld [vmem:[#allocation2 + $0xf20] sm:$0xff]  ;;  %728 = vmatpush.msrb.mxu2 %v496_v27  ;;  %v193_v27 = vld [vmem:[#allocation2 + $0x388] sm:$0xff] }
  0x6b   :  { %v364_v29 = vld [vmem:[#allocation2 + $0x8e0] sm:$0xff]  ;;  %747 = vmatpush.msrb.mxu3 %v564_v28  ;;  %v317_v28 = vld [vmem:[#allocation2 + $0x768] sm:$0xff] }
  0x6c   :  { %v436_v30 = vld [vmem:[#allocation2 + $0xb20] sm:$0xff]  ;;  %689 = vmatpush.msrb.mxu0 %v364_v29  ;;  %v117_v29 = vld [vmem:[#allocation2 + $0x128] sm:$0xff] }
  0x6d   :  { %v492_v31 = vld [vmem:[#allocation2 + $0xce0] sm:$0xff]  ;;  %707 = vmatpush.msrb.mxu1 %v436_v30  ;;  %v245_v30 = vld [vmem:[#allocation2 + $0x528] sm:$0xff] }
  0x6e   :  { %v560_v32 = vld [vmem:[#allocation2 + $0xf00] sm:$0xff]  ;;  %729 = vmatpush.msrb.mxu2 %v492_v31  ;;  %v189_v31 = vld [vmem:[#allocation2 + $0x368] sm:$0xff] }
  0x6f   :  { %v360_v33 = vld [vmem:[#allocation2 + $0x8c0] sm:$0xff]  ;;  %748 = vmatpush.msrb.mxu3 %v560_v32  ;;  %v313_v32 = vld [vmem:[#allocation2 + $0x748] sm:$0xff] }
  0x70   :  { %v432_v34 = vld [vmem:[#allocation2 + $0xb00] sm:$0xff]  ;;  %690 = vmatpush.msrb.mxu0 %v360_v33  ;;  %v113_v33 = vld [vmem:[#allocation2 + $0x108] sm:$0xff] }
  0x71   :  { %v488_v35 = vld [vmem:[#allocation2 + $0xcc0] sm:$0xff]  ;;  %708 = vmatpush.msrb.mxu1 %v432_v34  ;;  %v241_v34 = vld [vmem:[#allocation2 + $0x508] sm:$0xff] }
  0x72   :  { %v556_v36 = vld [vmem:[#allocation2 + $0xee0] sm:$0xff]  ;;  %730 = vmatpush.msrb.mxu2 %v488_v35  ;;  %v185_v35 = vld [vmem:[#allocation2 + $0x348] sm:$0xff] }
  0x73   :  { %v356_v37 = vld [vmem:[#allocation2 + $0x8a0] sm:$0xff]  ;;  %749 = vmatpush.msrb.mxu3 %v556_v36  ;;  %v309_v36 = vld [vmem:[#allocation2 + $0x728] sm:$0xff] }
  0x74   :  { %v428_v38 = vld [vmem:[#allocation2 + $0xae0] sm:$0xff]  ;;  %691 = vmatpush.msrb.mxu0 %v356_v37  ;;  %v109_v37 = vld [vmem:[#allocation2 + $0xe8] sm:$0xff] }
  0x75   :  { %v484_v39 = vld [vmem:[#allocation2 + $0xca0] sm:$0xff]  ;;  %709 = vmatpush.msrb.mxu1 %v428_v38  ;;  %v237_v38 = vld [vmem:[#allocation2 + $0x4e8] sm:$0xff] }
  0x76   :  { %v552_v40 = vld [vmem:[#allocation2 + $0xec0] sm:$0xff]  ;;  %731 = vmatpush.msrb.mxu2 %v484_v39  ;;  %v181_v39 = vld [vmem:[#allocation2 + $0x328] sm:$0xff] }
  0x77   :  { %v352_v41 = vld [vmem:[#allocation2 + $0x880] sm:$0xff]  ;;  %750 = vmatpush.msrb.mxu3 %v552_v40  ;;  %v305_v40 = vld [vmem:[#allocation2 + $0x708] sm:$0xff] }
  0x78   :  { %v424_v42 = vld [vmem:[#allocation2 + $0xac0] sm:$0xff]  ;;  %692 = vmatpush.msrb.mxu0 %v352_v41  ;;  %v105_v41 = vld [vmem:[#allocation2 + $0xc8] sm:$0xff] }
  0x79   :  { %v480_v43 = vld [vmem:[#allocation2 + $0xc80] sm:$0xff]  ;;  %710 = vmatpush.msrb.mxu1 %v424_v42  ;;  %v233_v42 = vld [vmem:[#allocation2 + $0x4c8] sm:$0xff] }
  0x7a   :  { %v548_v44 = vld [vmem:[#allocation2 + $0xea0] sm:$0xff]  ;;  %732 = vmatpush.msrb.mxu2 %v480_v43  ;;  %v177_v43 = vld [vmem:[#allocation2 + $0x308] sm:$0xff] }
  0x7b   :  { %v348_v46 = vld [vmem:[#allocation2 + $0x860] sm:$0xff]  ;;  %751 = vmatpush.msrb.mxu3 %v548_v44  ;;  %v301_v44 = vld [vmem:[#allocation2 + $0x6e8] sm:$0xff] }
  0x7c   :  { %v420_v47 = vld [vmem:[#allocation2 + $0xaa0] sm:$0xff]  ;;  %693 = vmatpush.msrb.mxu0 %v348_v46  ;;  %v101_v46 = vld [vmem:[#allocation2 + $0xa8] sm:$0xff] }
  0x7d   :  { %v476_v48 = vld [vmem:[#allocation2 + $0xc60] sm:$0xff]  ;;  %711 = vmatpush.msrb.mxu1 %v420_v47  ;;  %v229_v47 = vld [vmem:[#allocation2 + $0x4a8] sm:$0xff] }
  0x7e   :  { %v544_v49 = vld [vmem:[#allocation2 + $0xe80] sm:$0xff]  ;;  %733 = vmatpush.msrb.mxu2 %v476_v48  ;;  %v173_v48 = vld [vmem:[#allocation2 + $0x2e8] sm:$0xff] }
  0x7f   :  { %v1770_v50 = vld [vmem:[%s1990_s0] sm:$0xff]  ;;  %752 = vmatpush.msrb.mxu3 %v544_v49  ;;  %v297_v49 = vld [vmem:[#allocation2 + $0x6c8] sm:$0xff] }
  0x80   :  { %v344_v52 = vld [vmem:[#allocation2 + $0x840] sm:$0xff]  ;;  %617 = vmatmul.f32.vlgmr.msra.gmra.mxu0 %v1770_v50 }
  0x81   :  { %v416_v53 = vld [vmem:[#allocation2 + $0xa80] sm:$0xff]  ;;  %694 = vmatpush.msrb.mxu0 %v344_v52  ;;  %v97_v52 = vld [vmem:[#allocation2 + $0x88] sm:$0xff] }
  0x82   :  { %v472_v54 = vld [vmem:[#allocation2 + $0xc40] sm:$0xff]  ;;  %712 = vmatpush.msrb.mxu1 %v416_v53  ;;  %v225_v53 = vld [vmem:[#allocation2 + $0x488] sm:$0xff] }
  0x83   :  { %v540_v55 = vld [vmem:[#allocation2 + $0xe60] sm:$0xff]  ;;  %734 = vmatpush.msrb.mxu2 %v472_v54  ;;  %v169_v54 = vld [vmem:[#allocation2 + $0x2c8] sm:$0xff] }
  0x84   :  { %v340_v57 = vld [vmem:[#allocation2 + $0x820] sm:$0xff]  ;;  %753 = vmatpush.msrb.mxu3 %v540_v55  ;;  %v293_v55 = vld [vmem:[#allocation2 + $0x6a8] sm:$0xff] }
  0x85   :  { %v412_v58 = vld [vmem:[#allocation2 + $0xa60] sm:$0xff]  ;;  %695 = vmatpush.msrb.mxu0 %v340_v57  ;;  %v93_v57 = vld [vmem:[#allocation2 + $0x68] sm:$0xff] }
  0x86   :  { %v468_v59 = vld [vmem:[#allocation2 + $0xc20] sm:$0xff]  ;;  %713 = vmatpush.msrb.mxu1 %v412_v58  ;;  %v221_v58 = vld [vmem:[#allocation2 + $0x468] sm:$0xff] }
  0x87   :  { %v536_v60 = vld [vmem:[#allocation2 + $0xe40] sm:$0xff]  ;;  %735 = vmatpush.msrb.mxu2 %v468_v59  ;;  %v165_v59 = vld [vmem:[#allocation2 + $0x2a8] sm:$0xff] }
  0x88   :  { %v336_v61 = vld [vmem:[#allocation2 + $0x800] sm:$0xff]  ;;  %754 = vmatpush.msrb.mxu3 %v536_v60  ;;  %v289_v60 = vld [vmem:[#allocation2 + $0x688] sm:$0xff] }
  0x89   :  { %v408_v62 = vld [vmem:[#allocation2 + $0xa40] sm:$0xff]  ;;  %696 = vmatpush.msrb.mxu0 %v336_v61  ;;  %v89_v61 = vld [vmem:[#allocation2 + $0x48] sm:$0xff] }
  0x8a   :  { %v464_v63 = vld [vmem:[#allocation2 + $0xc00] sm:$0xff]  ;;  %714 = vmatpush.msrb.mxu1 %v408_v62  ;;  %v217_v62 = vld [vmem:[#allocation2 + $0x448] sm:$0xff] }
  0x8b   :  { %v532_v0 = vld [vmem:[#allocation2 + $0xe20] sm:$0xff]  ;;  %736 = vmatpush.msrb.mxu2 %v464_v63  ;;  %761 = vmatpush.msra.mxu0 %v141_v2  ;;  %v161_v63 = vld [vmem:[#allocation2 + $0x288] sm:$0xff] }
  0x8c   :  { %v404_v4 = vld [vmem:[#allocation2 + $0xa20] sm:$0xff]  ;;  %755 = vmatpush.msrb.mxu3 %v532_v0  ;;  %737 = vmatmul.f32.vlgmr.msrb.gmra.mxu2 %v1789_v1  ;;  %v285_v0 = vld [vmem:[#allocation2 + $0x668] sm:$0xff] }
  0x8d   :  { %v528_v5 = vld [vmem:[#allocation2 + $0xe00] sm:$0xff]  ;;  %801 = vmatpush.msra.mxu2 %v269_v3  ;;  %715 = vmatpush.msrb.mxu1 %v404_v4  ;;  %v85_v2 = vld [vmem:[#allocation2 + $0x28] sm:$0xff] }
  0x8e   :  { %v1794_v6 = vld [vmem:[%s1990_s0 + $0x20] sm:$0xff]  ;;  %756 = vmatpush.msrb.mxu3 %v528_v5  ;;  %762 = vmatpush.msra.mxu0 %v137_v8  ;;  %v213_v3 = vld [vmem:[#allocation2 + $0x428] sm:$0xff] }
  0x8f   :  { %697 = vmatmul.f32.vlgmr.msrb.gmra.mxu0 %v1794_v6  ;;  %v400_v11 = vld [vmem:[#allocation2 + $0xa00] sm:$0xff]  ;;  %757 = vmatmul.f32.vlgmr.msrb.gmra.mxu3 %v1800_v7  ;;  %v157_v4 = vld [vmem:[#allocation2 + $0x268] sm:$0xff] }
  0x90   :  { %802 = vmatpush.msra.mxu2 %v265_v9  ;;  %821 = vmatpush.msra.mxu3 %v333_v10  ;;  %v281_v5 = vld [vmem:[#allocation2 + $0x648] sm:$0xff] }
  0x91   :  { %716 = vmatpush.msrb.mxu1 %v400_v11  ;;  %763 = vmatpush.msra.mxu0 %v133_v12  ;;  %v81_v8 = vld [vmem:[#allocation2 + $0x8] sm:$0xff] }
  0x92   :  { %717 = vmatmul.f32.vlgmr.msrb.gmra.mxu1 %v1807_v13  ;;  %803 = vmatpush.msra.mxu2 %v261_v14  ;;  %v209_v9 = vld [vmem:[#allocation2 + $0x408] sm:$0xff] }
  0x93   :  { %781 = vmatpush.msra.mxu1 %v205_v15  ;;  %822 = vmatpush.msra.mxu3 %v329_v16  ;;  %v153_v10 = vld [vmem:[#allocation2 + $0x248] sm:$0xff] }
  0x94   :  { %764 = vmatpush.msra.mxu0 %v129_v17  ;;  %804 = vmatpush.msra.mxu2 %v257_v18  ;;  %v277_v11 = vld [vmem:[#allocation2 + $0x628] sm:$0xff] }
  0x95   :  { %782 = vmatpush.msra.mxu1 %v201_v19  ;;  %823 = vmatpush.msra.mxu3 %v325_v20  ;;  %v397_v12 = vld [vmem:[#allocation2 + $0x9e8] sm:$0xff] }
  0x96   :  { %765 = vmatpush.msra.mxu0 %v125_v21  ;;  %805 = vmatpush.msra.mxu2 %v253_v22  ;;  %v525_v14 = vld [vmem:[#allocation2 + $0xde8] sm:$0xff] }
  0x97   :  { %783 = vmatpush.msra.mxu1 %v197_v23  ;;  %824 = vmatpush.msra.mxu3 %v321_v24  ;;  %v149_v15 = vld [vmem:[#allocation2 + $0x228] sm:$0xff] }
  0x98   :  { %766 = vmatpush.msra.mxu0 %v121_v25  ;;  %806 = vmatpush.msra.mxu2 %v249_v26  ;;  %v273_v16 = vld [vmem:[#allocation2 + $0x608] sm:$0xff] }
  0x99   :  { %784 = vmatpush.msra.mxu1 %v193_v27  ;;  %825 = vmatpush.msra.mxu3 %v317_v28  ;;  %v393_v17 = vld [vmem:[#allocation2 + $0x9c8] sm:$0xff] }
  0x9a   :  { %767 = vmatpush.msra.mxu0 %v117_v29  ;;  %807 = vmatpush.msra.mxu2 %v245_v30  ;;  %v521_v18 = vld [vmem:[#allocation2 + $0xdc8] sm:$0xff] }
  0x9b   :  { %785 = vmatpush.msra.mxu1 %v189_v31  ;;  %826 = vmatpush.msra.mxu3 %v313_v32  ;;  %v589_v19 = vld [vmem:[#allocation2 + $0xfe8] sm:$0xff] }
  0x9c   :  { %768 = vmatpush.msra.mxu0 %v113_v33  ;;  %808 = vmatpush.msra.mxu2 %v241_v34  ;;  %v145_v20 = vld [vmem:[#allocation2 + $0x208] sm:$0xff] }
  0x9d   :  { %786 = vmatpush.msra.mxu1 %v185_v35  ;;  %827 = vmatpush.msra.mxu3 %v309_v36  ;;  %v389_v21 = vld [vmem:[#allocation2 + $0x9a8] sm:$0xff] }
  0x9e   :  { %769 = vmatpush.msra.mxu0 %v109_v37  ;;  %809 = vmatpush.msra.mxu2 %v237_v38  ;;  %v461_v22 = vld [vmem:[#allocation2 + $0xbe8] sm:$0xff] }
  0x9f   :  { %787 = vmatpush.msra.mxu1 %v181_v39  ;;  %828 = vmatpush.msra.mxu3 %v305_v40  ;;  %v517_v23 = vld [vmem:[#allocation2 + $0xda8] sm:$0xff] }
  0xa0   :  { %770 = vmatpush.msra.mxu0 %v105_v41  ;;  %810 = vmatpush.msra.mxu2 %v233_v42  ;;  %v585_v24 = vld [vmem:[#allocation2 + $0xfc8] sm:$0xff] }
  0xa1   :  { %788 = vmatpush.msra.mxu1 %v177_v43  ;;  %829 = vmatpush.msra.mxu3 %v301_v44  ;;  %v385_v25 = vld [vmem:[#allocation2 + $0x988] sm:$0xff] }
  0xa2   :  { %771 = vmatpush.msra.mxu0 %v101_v46  ;;  %811 = vmatpush.msra.mxu2 %v229_v47  ;;  %v457_v26 = vld [vmem:[#allocation2 + $0xbc8] sm:$0xff] }
  0xa3   :  { %789 = vmatpush.msra.mxu1 %v173_v48  ;;  %830 = vmatpush.msra.mxu3 %v297_v49  ;;  %v513_v27 = vld [vmem:[#allocation2 + $0xd88] sm:$0xff] }
  0xa4   :  { %772 = vmatpush.msra.mxu0 %v97_v52  ;;  %812 = vmatpush.msra.mxu2 %v225_v53  ;;  %v581_v28 = vld [vmem:[#allocation2 + $0xfa8] sm:$0xff] }
  0xa5   :  { %790 = vmatpush.msra.mxu1 %v169_v54  ;;  %831 = vmatpush.msra.mxu3 %v293_v55  ;;  %v381_v29 = vld [vmem:[#allocation2 + $0x968] sm:$0xff] }
  0xa6   :  { %773 = vmatpush.msra.mxu0 %v93_v57  ;;  %813 = vmatpush.msra.mxu2 %v221_v58  ;;  %v453_v30 = vld [vmem:[#allocation2 + $0xba8] sm:$0xff] }
  0xa7   :  { %791 = vmatpush.msra.mxu1 %v165_v59  ;;  %832 = vmatpush.msra.mxu3 %v289_v60  ;;  %v509_v31 = vld [vmem:[#allocation2 + $0xd68] sm:$0xff] }
  0xa8   :  { %774 = vmatpush.msra.mxu0 %v89_v61  ;;  %814 = vmatpush.msra.mxu2 %v217_v62  ;;  %v577_v32 = vld [vmem:[#allocation2 + $0xf88] sm:$0xff] }
  0xa9   :  { %792 = vmatpush.msra.mxu1 %v161_v63  ;;  %833 = vmatpush.msra.mxu3 %v285_v0  ;;  %v377_v33 = vld [vmem:[#allocation2 + $0x948] sm:$0xff] }
  0xaa   :  { %775 = vmatpush.msra.mxu0 %v85_v2  ;;  %815 = vmatpush.msra.mxu2 %v213_v3  ;;  %v449_v34 = vld [vmem:[#allocation2 + $0xb88] sm:$0xff] }
  0xab   :  { %793 = vmatpush.msra.mxu1 %v157_v4  ;;  %834 = vmatpush.msra.mxu3 %v281_v5  ;;  %v505_v35 = vld [vmem:[#allocation2 + $0xd48] sm:$0xff] }
  0xac   :  { %776 = vmatpush.msra.mxu0 %v81_v8  ;;  %816 = vmatpush.msra.mxu2 %v209_v9  ;;  %v573_v36 = vld [vmem:[#allocation2 + $0xf68] sm:$0xff] }
  0xad   :  { %794 = vmatpush.msra.mxu1 %v153_v10  ;;  %835 = vmatpush.msra.mxu3 %v277_v11  ;;  %v373_v37 = vld [vmem:[#allocation2 + $0x928] sm:$0xff] }
  0xae   :  { %841 = vmatpush.msrb.mxu0 %v397_v12  ;;  %881 = vmatpush.msrb.mxu2 %v525_v14  ;;  %v445_v38 = vld [vmem:[#allocation2 + $0xb68] sm:$0xff] }
  0xaf   :  { %795 = vmatpush.msra.mxu1 %v149_v15  ;;  %836 = vmatpush.msra.mxu3 %v273_v16  ;;  %v501_v39 = vld [vmem:[#allocation2 + $0xd28] sm:$0xff] }
  0xb0   :  { %842 = vmatpush.msrb.mxu0 %v393_v17  ;;  %882 = vmatpush.msrb.mxu2 %v521_v18  ;;  %v569_v40 = vld [vmem:[#allocation2 + $0xf48] sm:$0xff] }
  0xb1   :  { %901 = vmatpush.msrb.mxu3 %v589_v19  ;;  %796 = vmatpush.msra.mxu1 %v145_v20  ;;  %v369_v41 = vld [vmem:[#allocation2 + $0x908] sm:$0xff] }
  0xb2   :  { %843 = vmatpush.msrb.mxu0 %v389_v21  ;;  %883 = vmatpush.msrb.mxu2 %v517_v23  ;;  %v441_v42 = vld [vmem:[#allocation2 + $0xb48] sm:$0xff]  ;;  %v334_v23 = vld [vmem:[#allocation2 + $0x7f0] sm:$0xff] }
  0xb3   :  { %861 = vmatpush.msrb.mxu1 %v461_v22  ;;  %902 = vmatpush.msrb.mxu3 %v585_v24  ;;  %v497_v43 = vld [vmem:[#allocation2 + $0xd08] sm:$0xff]  ;;  %v266_v22 = vld [vmem:[#allocation2 + $0x5d0] sm:$0xff] }
  0xb4   :  { %844 = vmatpush.msrb.mxu0 %v385_v25  ;;  %884 = vmatpush.msrb.mxu2 %v513_v27  ;;  %v565_v44 = vld [vmem:[#allocation2 + $0xf28] sm:$0xff]  ;;  %v134_v25 = vld [vmem:[#allocation2 + $0x1b0] sm:$0xff] }
  0xb5   :  { %862 = vmatpush.msrb.mxu1 %v457_v26  ;;  %903 = vmatpush.msrb.mxu3 %v581_v28  ;;  %v365_v46 = vld [vmem:[#allocation2 + $0x8e8] sm:$0xff]  ;;  %v262_v26 = vld [vmem:[#allocation2 + $0x5b0] sm:$0xff] }
  0xb6   :  { %845 = vmatpush.msrb.mxu0 %v381_v29  ;;  %885 = vmatpush.msrb.mxu2 %v509_v31  ;;  %v437_v47 = vld [vmem:[#allocation2 + $0xb28] sm:$0xff]  ;;  %v206_v27 = vld [vmem:[#allocation2 + $0x3f0] sm:$0xff] }
  0xb7   :  { %863 = vmatpush.msrb.mxu1 %v453_v30  ;;  %904 = vmatpush.msrb.mxu3 %v577_v32  ;;  %v493_v48 = vld [vmem:[#allocation2 + $0xce8] sm:$0xff]  ;;  %v330_v28 = vld [vmem:[#allocation2 + $0x7d0] sm:$0xff] }
  0xb8   :  { %846 = vmatpush.msrb.mxu0 %v377_v33  ;;  %886 = vmatpush.msrb.mxu2 %v505_v35  ;;  %v561_v49 = vld [vmem:[#allocation2 + $0xf08] sm:$0xff]  ;;  %v258_v29 = vld [vmem:[#allocation2 + $0x590] sm:$0xff] }
  0xb9   :  { %864 = vmatpush.msrb.mxu1 %v449_v34  ;;  %905 = vmatpush.msrb.mxu3 %v573_v36  ;;  %v361_v52 = vld [vmem:[#allocation2 + $0x8c8] sm:$0xff]  ;;  %v202_v30 = vld [vmem:[#allocation2 + $0x3d0] sm:$0xff] }
  0xba   :  { %847 = vmatpush.msrb.mxu0 %v373_v37  ;;  %887 = vmatpush.msrb.mxu2 %v501_v39  ;;  %v433_v53 = vld [vmem:[#allocation2 + $0xb08] sm:$0xff]  ;;  %v326_v31 = vld [vmem:[#allocation2 + $0x7b0] sm:$0xff] }
  0xbb   :  { %865 = vmatpush.msrb.mxu1 %v445_v38  ;;  %906 = vmatpush.msrb.mxu3 %v569_v40  ;;  %v489_v54 = vld [vmem:[#allocation2 + $0xcc8] sm:$0xff]  ;;  %v254_v32 = vld [vmem:[#allocation2 + $0x570] sm:$0xff] }
  0xbc   :  { %848 = vmatpush.msrb.mxu0 %v369_v41  ;;  %888 = vmatpush.msrb.mxu2 %v497_v43  ;;  %v557_v55 = vld [vmem:[#allocation2 + $0xee8] sm:$0xff]  ;;  %v322_v33 = vld [vmem:[#allocation2 + $0x790] sm:$0xff] }
  0xbd   :  { %866 = vmatpush.msrb.mxu1 %v441_v42  ;;  %907 = vmatpush.msrb.mxu3 %v565_v44  ;;  %v357_v57 = vld [vmem:[#allocation2 + $0x8a8] sm:$0xff]  ;;  %v122_v34 = vld [vmem:[#allocation2 + $0x150] sm:$0xff] }
  0xbe   :  { %849 = vmatpush.msrb.mxu0 %v365_v46  ;;  %889 = vmatpush.msrb.mxu2 %v493_v48  ;;  %v429_v58 = vld [vmem:[#allocation2 + $0xae8] sm:$0xff]  ;;  %v250_v35 = vld [vmem:[#allocation2 + $0x550] sm:$0xff] }
  0xbf   :  { %867 = vmatpush.msrb.mxu1 %v437_v47  ;;  %908 = vmatpush.msrb.mxu3 %v561_v49  ;;  %v485_v59 = vld [vmem:[#allocation2 + $0xca8] sm:$0xff]  ;;  %v194_v36 = vld [vmem:[#allocation2 + $0x390] sm:$0xff] }
  0xc0   :  { %850 = vmatpush.msrb.mxu0 %v361_v52  ;;  %v553_v60 = vld [vmem:[#allocation2 + $0xec8] sm:$0xff]  ;;  %890 = vmatpush.msrb.mxu2 %v489_v54  ;;  %v318_v37 = vld [vmem:[#allocation2 + $0x770] sm:$0xff] }
  0xc1   :  { %868 = vmatpush.msrb.mxu1 %v433_v53  ;;  %909 = vmatpush.msrb.mxu3 %v557_v55  ;;  %v353_v61 = vld [vmem:[#allocation2 + $0x888] sm:$0xff]  ;;  %v246_v38 = vld [vmem:[#allocation2 + $0x530] sm:$0xff] }
  0xc2   :  { %v425_v62 = vld [vmem:[#allocation2 + $0xac8] sm:$0xff]  ;;  %851 = vmatpush.msrb.mxu0 %v357_v57  ;;  %891 = vmatpush.msrb.mxu2 %v485_v59  ;;  %v190_v39 = vld [vmem:[#allocation2 + $0x370] sm:$0xff] }
  0xc3   :  { %869 = vmatpush.msrb.mxu1 %v429_v58  ;;  %v481_v63 = vld [vmem:[#allocation2 + $0xc88] sm:$0xff]  ;;  %910 = vmatpush.msrb.mxu3 %v553_v60  ;;  %v314_v40 = vld [vmem:[#allocation2 + $0x750] sm:$0xff] }
  0xc4   :  { %v549_v0 = vld [vmem:[#allocation2 + $0xea8] sm:$0xff]  ;;  %852 = vmatpush.msrb.mxu0 %v353_v61  ;;  %892 = vmatpush.msrb.mxu2 %v481_v63  ;;  %v114_v41 = vld [vmem:[#allocation2 + $0x110] sm:$0xff] }
  0xc5   :  { %v349_v2 = vld [vmem:[#allocation2 + $0x868] sm:$0xff]  ;;  %870 = vmatpush.msrb.mxu1 %v425_v62  ;;  %911 = vmatpush.msrb.mxu3 %v549_v0  ;;  %v242_v42 = vld [vmem:[#allocation2 + $0x510] sm:$0xff] }
  0xc6   :  { %v421_v3 = vld [vmem:[#allocation2 + $0xaa8] sm:$0xff]  ;;  %817 = vmatmul.f32.vlgmr.msra.gmra.mxu2 %v1765_v45  ;;  %853 = vmatpush.msrb.mxu0 %v349_v2  ;;  %v186_v43 = vld [vmem:[#allocation2 + $0x350] sm:$0xff] }
  0xc7   :  { %v477_v4 = vld [vmem:[#allocation2 + $0xc68] sm:$0xff]  ;;  %871 = vmatpush.msrb.mxu1 %v421_v3  ;;  %777 = vmatmul.f32.vlgmr.msra.gmra.mxu0 %v1770_v50  ;;  %v142_v50 = vld [vmem:[#allocation2 + $0x1f0] sm:$0xff] }
  0xc8   :  { %v545_v5 = vld [vmem:[#allocation2 + $0xe88] sm:$0xff]  ;;  %893 = vmatpush.msrb.mxu2 %v477_v4  ;;  %837 = vmatmul.f32.vlgmr.msra.gmra.mxu3 %v1776_v51  ;;  %v270_v51 = vld [vmem:[#allocation2 + $0x5f0] sm:$0xff] }
  0xc9   :  { %v345_v8 = vld [vmem:[#allocation2 + $0x848] sm:$0xff]  ;;  %912 = vmatpush.msrb.mxu3 %v545_v5  ;;  %797 = vmatmul.f32.vlgmr.msra.gmra.mxu1 %v1782_v56  ;;  %v138_v56 = vld [vmem:[#allocation2 + $0x1d0] sm:$0xff] }
  0xca   :  { %v417_v9 = vld [vmem:[#allocation2 + $0xa88] sm:$0xff]  ;;  %854 = vmatpush.msrb.mxu0 %v345_v8  ;;  %v310_v44 = vld [vmem:[#allocation2 + $0x730] sm:$0xff] }
  0xcb   :  { %v473_v10 = vld [vmem:[#allocation2 + $0xc48] sm:$0xff]  ;;  %872 = vmatpush.msrb.mxu1 %v417_v9  ;;  %v110_v46 = vld [vmem:[#allocation2 + $0xf0] sm:$0xff] }
  0xcc   :  { %v541_v11 = vld [vmem:[#allocation2 + $0xe68] sm:$0xff]  ;;  %894 = vmatpush.msrb.mxu2 %v473_v10  ;;  %v238_v47 = vld [vmem:[#allocation2 + $0x4f0] sm:$0xff] }
  0xcd   :  { %v341_v12 = vld [vmem:[#allocation2 + $0x828] sm:$0xff]  ;;  %913 = vmatpush.msrb.mxu3 %v541_v11  ;;  %v182_v48 = vld [vmem:[#allocation2 + $0x330] sm:$0xff] }
  0xce   :  { %v413_v14 = vld [vmem:[#allocation2 + $0xa68] sm:$0xff]  ;;  %855 = vmatpush.msrb.mxu0 %v341_v12  ;;  %v306_v49 = vld [vmem:[#allocation2 + $0x710] sm:$0xff] }
  0xcf   :  { %v469_v15 = vld [vmem:[#allocation2 + $0xc28] sm:$0xff]  ;;  %873 = vmatpush.msrb.mxu1 %v413_v14  ;;  %v106_v52 = vld [vmem:[#allocation2 + $0xd0] sm:$0xff] }
  0xd0   :  { %v537_v16 = vld [vmem:[#allocation2 + $0xe48] sm:$0xff]  ;;  %895 = vmatpush.msrb.mxu2 %v469_v15  ;;  %v234_v53 = vld [vmem:[#allocation2 + $0x4d0] sm:$0xff] }
  0xd1   :  { %v337_v45 = vld [vmem:[#allocation2 + $0x808] sm:$0xff]  ;;  %914 = vmatpush.msrb.mxu3 %v537_v16  ;;  %v178_v54 = vld [vmem:[#allocation2 + $0x310] sm:$0xff] }
  0xd2   :  { %v409_v17 = vld [vmem:[#allocation2 + $0xa48] sm:$0xff]  ;;  %856 = vmatpush.msrb.mxu0 %v337_v45  ;;  %v302_v55 = vld [vmem:[#allocation2 + $0x6f0] sm:$0xff] }
  0xd3   :  { %v465_v18 = vld [vmem:[#allocation2 + $0xc08] sm:$0xff]  ;;  %874 = vmatpush.msrb.mxu1 %v409_v17  ;;  %857 = vmatmul.f32.vlgmr.msrb.gmra.mxu0 %v1794_v6  ;;  %v126_v6 = vld [vmem:[#allocation2 + $0x170] sm:$0xff] }
  0xd4   :  { %v533_v19 = vld [vmem:[#allocation2 + $0xe28] sm:$0xff]  ;;  %896 = vmatpush.msrb.mxu2 %v465_v18  ;;  %921 = vmatpush.msra.mxu0 %v142_v50  ;;  %v102_v57 = vld [vmem:[#allocation2 + $0xb0] sm:$0xff] }
  0xd5   :  { %v405_v20 = vld [vmem:[#allocation2 + $0xa28] sm:$0xff]  ;;  %915 = vmatpush.msrb.mxu3 %v533_v19  ;;  %897 = vmatmul.f32.vlgmr.msrb.gmra.mxu2 %v1789_v1  ;;  %v130_v1 = vld [vmem:[#allocation2 + $0x190] sm:$0xff] }
  0xd6   :  { %v529_v21 = vld [vmem:[#allocation2 + $0xe08] sm:$0xff]  ;;  %961 = vmatpush.msra.mxu2 %v270_v51  ;;  %875 = vmatpush.msrb.mxu1 %v405_v20  ;;  %v230_v58 = vld [vmem:[#allocation2 + $0x4b0] sm:$0xff] }
  0xd7   :  { %916 = vmatpush.msrb.mxu3 %v529_v21  ;;  %v401_v24 = vld [vmem:[#allocation2 + $0xa08] sm:$0xff]  ;;  %922 = vmatpush.msra.mxu0 %v138_v56  ;;  %v174_v59 = vld [vmem:[#allocation2 + $0x2f0] sm:$0xff] }
  0xd8   :  { %917 = vmatmul.f32.vlgmr.msrb.gmra.mxu3 %v1800_v7  ;;  %962 = vmatpush.msra.mxu2 %v266_v22  ;;  %v198_v7 = vld [vmem:[#allocation2 + $0x3b0] sm:$0xff] }
  0xd9   :  { %981 = vmatpush.msra.mxu3 %v334_v23  ;;  %876 = vmatpush.msrb.mxu1 %v401_v24  ;;  %v298_v60 = vld [vmem:[#allocation2 + $0x6d0] sm:$0xff] }
  0xda   :  { %923 = vmatpush.msra.mxu0 %v134_v25  ;;  %877 = vmatmul.f32.vlgmr.msrb.gmra.mxu1 %v1807_v13  ;;  %v118_v13 = vld [vmem:[#allocation2 + $0x130] sm:$0xff] }
  0xdb   :  { %963 = vmatpush.msra.mxu2 %v262_v26  ;;  %941 = vmatpush.msra.mxu1 %v206_v27  ;;  %v98_v61 = vld [vmem:[#allocation2 + $0x90] sm:$0xff] }
  0xdc   :  { %982 = vmatpush.msra.mxu3 %v330_v28  ;;  %924 = vmatpush.msra.mxu0 %v130_v1  ;;  %v226_v62 = vld [vmem:[#allocation2 + $0x490] sm:$0xff] }
  0xdd   :  { %964 = vmatpush.msra.mxu2 %v258_v29  ;;  %942 = vmatpush.msra.mxu1 %v202_v30  ;;  %v170_v63 = vld [vmem:[#allocation2 + $0x2d0] sm:$0xff] }
  0xde   :  { %983 = vmatpush.msra.mxu3 %v326_v31  ;;  %925 = vmatpush.msra.mxu0 %v126_v6  ;;  %v294_v0 = vld [vmem:[#allocation2 + $0x6b0] sm:$0xff] }
  0xdf   :  { %965 = vmatpush.msra.mxu2 %v254_v32  ;;  %943 = vmatpush.msra.mxu1 %v198_v7  ;;  %v94_v2 = vld [vmem:[#allocation2 + $0x70] sm:$0xff] }
  0xe0   :  { %984 = vmatpush.msra.mxu3 %v322_v33  ;;  %926 = vmatpush.msra.mxu0 %v122_v34  ;;  %v222_v3 = vld [vmem:[#allocation2 + $0x470] sm:$0xff] }
  0xe1   :  { %966 = vmatpush.msra.mxu2 %v250_v35  ;;  %944 = vmatpush.msra.mxu1 %v194_v36  ;;  %v166_v4 = vld [vmem:[#allocation2 + $0x2b0] sm:$0xff] }
  0xe2   :  { %985 = vmatpush.msra.mxu3 %v318_v37  ;;  %927 = vmatpush.msra.mxu0 %v118_v13  ;;  %v290_v5 = vld [vmem:[#allocation2 + $0x690] sm:$0xff] }
  0xe3   :  { %967 = vmatpush.msra.mxu2 %v246_v38  ;;  %945 = vmatpush.msra.mxu1 %v190_v39  ;;  %v90_v8 = vld [vmem:[#allocation2 + $0x50] sm:$0xff] }
  0xe4   :  { %986 = vmatpush.msra.mxu3 %v314_v40  ;;  %928 = vmatpush.msra.mxu0 %v114_v41  ;;  %v218_v9 = vld [vmem:[#allocation2 + $0x450] sm:$0xff] }
  0xe5   :  { %968 = vmatpush.msra.mxu2 %v242_v42  ;;  %946 = vmatpush.msra.mxu1 %v186_v43  ;;  %v162_v10 = vld [vmem:[#allocation2 + $0x290] sm:$0xff] }
  0xe6   :  { %987 = vmatpush.msra.mxu3 %v310_v44  ;;  %929 = vmatpush.msra.mxu0 %v110_v46  ;;  %v286_v11 = vld [vmem:[#allocation2 + $0x670] sm:$0xff] }
  0xe7   :  { %969 = vmatpush.msra.mxu2 %v238_v47  ;;  %947 = vmatpush.msra.mxu1 %v182_v48  ;;  %v86_v12 = vld [vmem:[#allocation2 + $0x30] sm:$0xff] }
  0xe8   :  { %988 = vmatpush.msra.mxu3 %v306_v49  ;;  %930 = vmatpush.msra.mxu0 %v106_v52  ;;  %v214_v14 = vld [vmem:[#allocation2 + $0x430] sm:$0xff] }
  0xe9   :  { %970 = vmatpush.msra.mxu2 %v234_v53  ;;  %948 = vmatpush.msra.mxu1 %v178_v54  ;;  %v158_v15 = vld [vmem:[#allocation2 + $0x270] sm:$0xff] }
  0xea   :  { %989 = vmatpush.msra.mxu3 %v302_v55  ;;  %931 = vmatpush.msra.mxu0 %v102_v57  ;;  %v282_v16 = vld [vmem:[#allocation2 + $0x650] sm:$0xff] }
  0xeb   :  { %971 = vmatpush.msra.mxu2 %v230_v58  ;;  %949 = vmatpush.msra.mxu1 %v174_v59  ;;  %v82_v45 = vld [vmem:[#allocation2 + $0x10] sm:$0xff] }
  0xec   :  { %990 = vmatpush.msra.mxu3 %v298_v60  ;;  %932 = vmatpush.msra.mxu0 %v98_v61  ;;  %v210_v17 = vld [vmem:[#allocation2 + $0x410] sm:$0xff] }
  0xed   :  { %972 = vmatpush.msra.mxu2 %v226_v62  ;;  %950 = vmatpush.msra.mxu1 %v170_v63  ;;  %v154_v18 = vld [vmem:[#allocation2 + $0x250] sm:$0xff] }
  0xee   :  { %991 = vmatpush.msra.mxu3 %v294_v0  ;;  %933 = vmatpush.msra.mxu0 %v94_v2  ;;  %v278_v19 = vld [vmem:[#allocation2 + $0x630] sm:$0xff]  ;;  %v638_v2 = vpop.f32.mrf.mxu1 }
  0xef   :  { %973 = vmatpush.msra.mxu2 %v222_v3  ;;  %951 = vmatpush.msra.mxu1 %v166_v4  ;;  %v398_v50 = vld [vmem:[#allocation2 + $0x9f0] sm:$0xff] }
  0xf0   :  { %992 = vmatpush.msra.mxu3 %v290_v5  ;;  %934 = vmatpush.msra.mxu0 %v90_v8  ;;  %v526_v51 = vld [vmem:[#allocation2 + $0xdf0] sm:$0xff]  ;;  %v658_v8 = vpop.f32.mrf.mxu2 }
  0xf1   :  { %974 = vmatpush.msra.mxu2 %v218_v9  ;;  %952 = vmatpush.msra.mxu1 %v162_v10  ;;  %v150_v20 = vld [vmem:[#allocation2 + $0x230] sm:$0xff] }
  0xf2   :  { %993 = vmatpush.msra.mxu3 %v286_v11  ;;  %935 = vmatpush.msra.mxu0 %v86_v12  ;;  %v274_v21 = vld [vmem:[#allocation2 + $0x610] sm:$0xff] }
  0xf3   :  { %975 = vmatpush.msra.mxu2 %v214_v14  ;;  %953 = vmatpush.msra.mxu1 %v158_v15  ;;  %v394_v56 = vld [vmem:[#allocation2 + $0x9d0] sm:$0xff] }
  0xf4   :  { %994 = vmatpush.msra.mxu3 %v282_v16  ;;  %936 = vmatpush.msra.mxu0 %v82_v45  ;;  %v522_v22 = vld [vmem:[#allocation2 + $0xdd0] sm:$0xff]  ;;  %v678_v16 = vpop.f32.mrf.mxu3 }
  0xf5   :  { %976 = vmatpush.msra.mxu2 %v210_v17  ;;  %954 = vmatpush.msra.mxu1 %v154_v18  ;;  %v590_v23 = vld [vmem:[#allocation2 + $0xff0] sm:$0xff] }
  0xf6   :  { %995 = vmatpush.msra.mxu3 %v278_v19  ;;  %1001 = vmatpush.msrb.mxu0 %v398_v50  ;;  %v146_v24 = vld [vmem:[#allocation2 + $0x210] sm:$0xff] }
  0xf7   :  { %1041 = vmatpush.msrb.mxu2 %v526_v51  ;;  %955 = vmatpush.msra.mxu1 %v150_v20  ;;  %v390_v25 = vld [vmem:[#allocation2 + $0x9b0] sm:$0xff] }
  0xf8   :  { %996 = vmatpush.msra.mxu3 %v274_v21  ;;  %v462_v26 = vld [vmem:[#allocation2 + $0xbf0] sm:$0xff]  ;;  %1002 = vmatpush.msrb.mxu0 %v394_v56  ;;  %v1833_v21 = vld [vmem:[%s1990_s0] sm:$0xff] }
  0xf9   :  { %1042 = vmatpush.msrb.mxu2 %v522_v22  ;;  %v518_v27 = vld [vmem:[#allocation2 + $0xdb0] sm:$0xff]  ;;  %956 = vmatpush.msra.mxu1 %v146_v24 }
  0xfa   :  { %v586_v28 = vld [vmem:[#allocation2 + $0xfd0] sm:$0xff]  ;;  %1061 = vmatpush.msrb.mxu3 %v590_v23  ;;  %1003 = vmatpush.msrb.mxu0 %v390_v25  ;;  %v1839_v23 = vld [vmem:[%s1990_s0 + $0x18] sm:$0xff] }
  0xfb   :  { %v386_v1 = vld [vmem:[#allocation2 + $0x990] sm:$0xff]  ;;  %1021 = vmatpush.msrb.mxu1 %v462_v26  ;;  %1043 = vmatpush.msrb.mxu2 %v518_v27 }
  0xfc   :  { %v458_v29 = vld [vmem:[#allocation2 + $0xbd0] sm:$0xff]  ;;  %1062 = vmatpush.msrb.mxu3 %v586_v28  ;;  %1004 = vmatpush.msrb.mxu0 %v386_v1  ;;  %v1845_v28 = vld [vmem:[%s1990_s0 + $0x8] sm:$0xff] }
  0xfd   :  { %v514_v30 = vld [vmem:[#allocation2 + $0xd90] sm:$0xff]  ;;  %1022 = vmatpush.msrb.mxu1 %v458_v29  ;;  %v618_v57 = vpop.f32.mrf.mxu0  ;;  %937 = vmatmul.f32.vlgmr.msra.gmra.mxu0 %v1833_v21 }
  0xfe   :  { %v582_v31 = vld [vmem:[#allocation2 + $0xfb0] sm:$0xff]  ;;  %1044 = vmatpush.msrb.mxu2 %v514_v30  ;;  %997 = vmatmul.f32.vlgmr.msra.gmra.mxu3 %v1839_v23 }
  0xff   :  { %v382_v6 = vld [vmem:[#allocation2 + $0x970] sm:$0xff]  ;;  %1063 = vmatpush.msrb.mxu3 %v582_v31  ;;  %957 = vmatmul.f32.vlgmr.msra.gmra.mxu1 %v1845_v28 }
 0x100   :  { %v454_v32 = vld [vmem:[#allocation2 + $0xbb0] sm:$0xff]  ;;  %1005 = vmatpush.msrb.mxu0 %v382_v6 }
 0x101   :  { %v510_v7 = vld [vmem:[#allocation2 + $0xd70] sm:$0xff]  ;;  %1023 = vmatpush.msrb.mxu1 %v454_v32 }
 0x102   :  { %v578_v33 = vld [vmem:[#allocation2 + $0xf90] sm:$0xff]  ;;  %1045 = vmatpush.msrb.mxu2 %v510_v7 }
 0x103   :  { %v378_v34 = vld [vmem:[#allocation2 + $0x950] sm:$0xff]  ;;  %1064 = vmatpush.msrb.mxu3 %v578_v33  ;;  %v143_v33 = vld [vmem:[#allocation2 + $0x1f8] sm:$0xff] }
 0x104   :  { %v450_v35 = vld [vmem:[#allocation2 + $0xb90] sm:$0xff]  ;;  %1006 = vmatpush.msrb.mxu0 %v378_v34  ;;  %v271_v34 = vld [vmem:[#allocation2 + $0x5f8] sm:$0xff] }
 0x105   :  { %v506_v36 = vld [vmem:[#allocation2 + $0xd50] sm:$0xff]  ;;  %1024 = vmatpush.msrb.mxu1 %v450_v35 }
 0x106   :  { %v574_v37 = vld [vmem:[#allocation2 + $0xf70] sm:$0xff]  ;;  %1046 = vmatpush.msrb.mxu2 %v506_v36 }
 0x107   :  { %v374_v13 = vld [vmem:[#allocation2 + $0x930] sm:$0xff]  ;;  %1065 = vmatpush.msrb.mxu3 %v574_v37 }
 0x108   :  { %v446_v38 = vld [vmem:[#allocation2 + $0xb70] sm:$0xff]  ;;  %1007 = vmatpush.msrb.mxu0 %v374_v13 }
 0x109   :  { %v1821_v39 = vld [vmem:[%s1992_s2] ss:$8 sm:$0xf]  ;;  %1025 = vmatpush.msrb.mxu1 %v446_v38 }
 0x10a   :  { %v502_v40 = vld [vmem:[#allocation2 + $0xd30] sm:$0xff]  ;;  %v593_v47 = vperm.slane %v1821_v39, 0 }
 0x10b   :  { %v570_v41 = vld [vmem:[#allocation2 + $0xf50] sm:$0xff]  ;;  %1047 = vmatpush.msrb.mxu2 %v502_v40  ;;  %v139_v40 = vld [vmem:[#allocation2 + $0x1d8] sm:$0xff] }
 0x10c   :  { %v370_v42 = vld [vmem:[#allocation2 + $0x910] sm:$0xff]  ;;  %1066 = vmatpush.msrb.mxu3 %v570_v41  ;;  %v619_v60 = vadd.f32 %v618_v57, %v593_v47  ;;  %v698_v20 = vpop.f32.mrf.mxu0  ;;  %v135_v47 = vld [vmem:[#allocation2 + $0x1b8] sm:$0xff] }
 0x10d   :  { %v442_v43 = vld [vmem:[#allocation2 + $0xb50] sm:$0xff]  ;;  %1008 = vmatpush.msrb.mxu0 %v370_v42  ;;  %v267_v42 = vld [vmem:[#allocation2 + $0x5d8] sm:$0xff] }
 0x10e   :  { %v498_v44 = vld [vmem:[#allocation2 + $0xd10] sm:$0xff]  ;;  %1026 = vmatpush.msrb.mxu1 %v442_v43  ;;  %v639_v5 = vadd.f32 %v638_v2, %v619_v60  ;;  %v335_v43 = vld [vmem:[#allocation2 + $0x7f8] sm:$0xff] }
 0x10f   :  { %v566_v46 = vld [vmem:[#allocation2 + $0xf30] sm:$0xff]  ;;  %1048 = vmatpush.msrb.mxu2 %v498_v44  ;;  %v718_v30 = vpop.f32.mrf.mxu1  ;;  %v738_v31 = vpop.f32.mrf.mxu2  ;;  %v1859_v44 = vld [vmem:[%s1990_s0 + $0x20] sm:$0xff]  ;;  %v131_v57 = vld [vmem:[#allocation2 + $0x198] sm:$0xff] }
 0x110   :  { %v366_v48 = vld [vmem:[#allocation2 + $0x8f0] sm:$0xff]  ;;  %1067 = vmatpush.msrb.mxu3 %v566_v46  ;;  %v659_v12 = vadd.f32 %v658_v8, %v639_v5  ;;  %v203_v60 = vld [vmem:[#allocation2 + $0x3d8] sm:$0xff] }
 0x111   :  { %v438_v49 = vld [vmem:[#allocation2 + $0xb30] sm:$0xff]  ;;  %1009 = vmatpush.msrb.mxu0 %v366_v48  ;;  %v199_v2 = vld [vmem:[#allocation2 + $0x3b8] sm:$0xff] }
 0x112   :  { %v494_v52 = vld [vmem:[#allocation2 + $0xcf0] sm:$0xff]  ;;  %1027 = vmatpush.msrb.mxu1 %v438_v49  ;;  %v679_v17 = vadd.f32 %v678_v16, %v659_v12  ;;  %v758_v37 = vpop.f32.mrf.mxu3  ;;  %v1868_v49 = vld [vmem:[%s1990_s0 + $0x38] sm:$0xff] }
 0x113   :  { %v562_v53 = vld [vmem:[#allocation2 + $0xf10] sm:$0xff]  ;;  %1049 = vmatpush.msrb.mxu2 %v494_v52  ;;  %v263_v52 = vld [vmem:[#allocation2 + $0x5b8] sm:$0xff] }
 0x114   :  { %v362_v54 = vld [vmem:[#allocation2 + $0x8d0] sm:$0xff]  ;;  %1068 = vmatpush.msrb.mxu3 %v562_v53  ;;  %v699_v22 = vadd.f32 %v698_v20, %v679_v17  ;;  %v207_v53 = vld [vmem:[#allocation2 + $0x3f8] sm:$0xff] }
 0x115   :  { %v434_v55 = vld [vmem:[#allocation2 + $0xb10] sm:$0xff]  ;;  %1010 = vmatpush.msrb.mxu0 %v362_v54  ;;  %v331_v54 = vld [vmem:[#allocation2 + $0x7d8] sm:$0xff] }
 0x116   :  { %v490_v58 = vld [vmem:[#allocation2 + $0xcd0] sm:$0xff]  ;;  %1028 = vmatpush.msrb.mxu1 %v434_v55  ;;  %v719_v7 = vadd.f32 %v718_v30, %v699_v22  ;;  %v123_v5 = vld [vmem:[#allocation2 + $0x158] sm:$0xff] }
 0x117   :  { %v558_v59 = vld [vmem:[#allocation2 + $0xef0] sm:$0xff]  ;;  %1050 = vmatpush.msrb.mxu2 %v490_v58  ;;  %v259_v58 = vld [vmem:[#allocation2 + $0x598] sm:$0xff] }
 0x118   :  { %v358_v61 = vld [vmem:[#allocation2 + $0x8b0] sm:$0xff]  ;;  %1069 = vmatpush.msrb.mxu3 %v558_v59  ;;  %v739_v36 = vadd.f32 %v738_v31, %v719_v7  ;;  %v1877_v59 = vld [vmem:[%s1990_s0 + $0x28] sm:$0xff]  ;;  %v251_v8 = vld [vmem:[#allocation2 + $0x558] sm:$0xff] }
 0x119   :  { %v430_v62 = vld [vmem:[#allocation2 + $0xaf0] sm:$0xff]  ;;  %1011 = vmatpush.msrb.mxu0 %v358_v61  ;;  %v327_v61 = vld [vmem:[#allocation2 + $0x7b8] sm:$0xff] }
 0x11a   :  { %v486_v63 = vld [vmem:[#allocation2 + $0xcb0] sm:$0xff]  ;;  %1029 = vmatpush.msrb.mxu1 %v430_v62  ;;  %v1854_v41 = vadd.f32 %v758_v37, %v739_v36  ;;  %v247_v12 = vld [vmem:[#allocation2 + $0x538] sm:$0xff] }
 0x11b   :  { %v554_v0 = vld [vmem:[#allocation2 + $0xed0] sm:$0xff]  ;;  %1051 = vmatpush.msrb.mxu2 %v486_v63  ;;  %v127_v63 = vld [vmem:[#allocation2 + $0x178] sm:$0xff] }
 0x11c   :  { %v354_v3 = vld [vmem:[#allocation2 + $0x890] sm:$0xff]  ;;  %1070 = vmatpush.msrb.mxu3 %v554_v0  ;;  %v1863_v48 = vmul.f32 0.70710677, %v1854_v41  ;;  %v255_v0 = vld [vmem:[#allocation2 + $0x578] sm:$0xff] }
 0x11d   :  { %v426_v4 = vld [vmem:[#allocation2 + $0xad0] sm:$0xff]  ;;  %1012 = vmatpush.msrb.mxu0 %v354_v3  ;;  %v323_v3 = vld [vmem:[#allocation2 + $0x798] sm:$0xff] }
 0x11e   :  { %v482_v9 = vld [vmem:[#allocation2 + $0xc90] sm:$0xff]  ;;  %1030 = vmatpush.msrb.mxu1 %v426_v4  ;;  %v1872_v55 = vand.u32 2147483647, %v1863_v48  ;;  %v115_v16 = vld [vmem:[#allocation2 + $0x118] sm:$0xff]  ;;  %vm1249_vm4 = vcmp.lt.f32.partialorder %v1863_v48, 0.0 }
 0x11f   :  { %v550_v10 = vld [vmem:[#allocation2 + $0xeb0] sm:$0xff]  ;;  %1052 = vmatpush.msrb.mxu2 %v482_v9  ;;  %v195_v9 = vld [vmem:[#allocation2 + $0x398] sm:$0xff] }
 0x120   :  { %v350_v11 = vld [vmem:[#allocation2 + $0x870] sm:$0xff]  ;;  %1071 = vmatpush.msrb.mxu3 %v550_v10  ;;  %v1261_v62 = vmul.f32 0.3275911, %v1872_v55  ;;  %v319_v10 = vld [vmem:[#allocation2 + $0x778] sm:$0xff] }
 0x121   :  { %v422_v14 = vld [vmem:[#allocation2 + $0xab0] sm:$0xff]  ;;  %1013 = vmatpush.msrb.mxu0 %v350_v11  ;;  %v119_v11 = vld [vmem:[#allocation2 + $0x138] sm:$0xff] }
 0x122   :  { %v478_v15 = vld [vmem:[#allocation2 + $0xc70] sm:$0xff]  ;;  %1031 = vmatpush.msrb.mxu1 %v422_v14  ;;  %v1881_v4 = vadd.f32 1.0, %v1261_v62  ;;  %v191_v14 = vld [vmem:[#allocation2 + $0x378] sm:$0xff] }
 0x123   :  { %v546_v45 = vld [vmem:[#allocation2 + $0xe90] sm:$0xff]  ;;  %1053 = vmatpush.msrb.mxu2 %v478_v15  ;;  %v315_v15 = vld [vmem:[#allocation2 + $0x758] sm:$0xff] }
 0x124   :  { %v1827_v18 = vld [vmem:[%s1990_s0 + $0x10] sm:$0xff]  ;;  %1072 = vmatpush.msrb.mxu3 %v546_v45  ;;  %1609 = vrcp.f32 %v1881_v4  ;;  %v243_v45 = vld [vmem:[#allocation2 + $0x518] sm:$0xff]  ;;  %vm1274_vm0 = vweird.f32 %v1881_v4 }
 0x125   :  { %977 = vmatmul.f32.vlgmr.msra.gmra.mxu2 %v1827_v18  ;;  %v346_v19 = vld [vmem:[#allocation2 + $0x850] sm:$0xff]  ;;  %v187_v17 = vld [vmem:[#allocation2 + $0x358] sm:$0xff] }
 0x126   :  { %v418_v50 = vld [vmem:[#allocation2 + $0xa90] sm:$0xff]  ;;  %1014 = vmatpush.msrb.mxu0 %v346_v19  ;;  %v311_v19 = vld [vmem:[#allocation2 + $0x738] sm:$0xff] }
 0x127   :  { %v474_v51 = vld [vmem:[#allocation2 + $0xc50] sm:$0xff]  ;;  %1032 = vmatpush.msrb.mxu1 %v418_v50  ;;  %v111_v50 = vld [vmem:[#allocation2 + $0xf8] sm:$0xff] }
 0x128   :  { %v542_v56 = vld [vmem:[#allocation2 + $0xe70] sm:$0xff]  ;;  %1054 = vmatpush.msrb.mxu2 %v474_v51  ;;  %v239_v51 = vld [vmem:[#allocation2 + $0x4f8] sm:$0xff] }
 0x129   :  { %v342_v24 = vld [vmem:[#allocation2 + $0x830] sm:$0xff]  ;;  %1073 = vmatpush.msrb.mxu3 %v542_v56  ;;  %v183_v56 = vld [vmem:[#allocation2 + $0x338] sm:$0xff] }
 0x12a   :  { %v414_v25 = vld [vmem:[#allocation2 + $0xa70] sm:$0xff]  ;;  %1015 = vmatpush.msrb.mxu0 %v342_v24  ;;  %v1610_v20 = vpop.eup %1609  ;;  %v307_v22 = vld [vmem:[#allocation2 + $0x718] sm:$0xff] }
 0x12b   :  { %v470_v26 = vld [vmem:[#allocation2 + $0xc30] sm:$0xff]  ;;  %1033 = vmatpush.msrb.mxu1 %v414_v25  ;;  %v1270_v24 = vmul.f32 %v1610_v20, %v1881_v4  ;;  %v107_v25 = vld [vmem:[#allocation2 + $0xd8] sm:$0xff]  ;;  %vm1275_vm1 = vweird.f32 %v1610_v20 }
 0x12c   :  { %v538_v27 = vld [vmem:[#allocation2 + $0xe50] sm:$0xff]  ;;  %1055 = vmatpush.msrb.mxu2 %v470_v26  ;;  %v235_v26 = vld [vmem:[#allocation2 + $0x4d8] sm:$0xff]  ;;  %vm1276_vm2 = vmor %vm1274_vm0, %vm1275_vm1 }
 0x12d   :  { %v338_v1 = vld [vmem:[#allocation2 + $0x810] sm:$0xff]  ;;  %1074 = vmatpush.msrb.mxu3 %v538_v27  ;;  %v179_v27 = vld [vmem:[#allocation2 + $0x318] sm:$0xff] }
 0x12e   :  { %v410_v29 = vld [vmem:[#allocation2 + $0xa50] sm:$0xff]  ;;  %1016 = vmatpush.msrb.mxu0 %v338_v1  ;;  %v303_v1 = vld [vmem:[#allocation2 + $0x6f8] sm:$0xff] }
 0x12f   :  { %v466_v6 = vld [vmem:[#allocation2 + $0xc10] sm:$0xff]  ;;  %1034 = vmatpush.msrb.mxu1 %v410_v29  ;;  %1017 = vmatmul.f32.vlgmr.msrb.gmra.mxu0 %v1859_v44  ;;  %v1271_v29 = vsub.f32 1.0, %v1270_v24  ;;  %v103_v30 = vld [vmem:[#allocation2 + $0xb8] sm:$0xff] }
 0x130   :  { %v534_v32 = vld [vmem:[#allocation2 + $0xe30] sm:$0xff]  ;;  %1056 = vmatpush.msrb.mxu2 %v466_v6  ;;  %1081 = vmatpush.msra.mxu0 %v143_v33  ;;  %v231_v31 = vld [vmem:[#allocation2 + $0x4b8] sm:$0xff]  ;;  %v1280_v6 = vand.u32 2147483648, %v1881_v4 }
 0x131   :  { %v406_v35 = vld [vmem:[#allocation2 + $0xa30] sm:$0xff]  ;;  %1075 = vmatpush.msrb.mxu3 %v534_v32  ;;  %v175_v32 = vld [vmem:[#allocation2 + $0x2f8] sm:$0xff]  ;;  %v1272_v33 = vmul.f32 %v1610_v20, %v1271_v29 }
 0x132   :  { %v530_v13 = vld [vmem:[#allocation2 + $0xe10] sm:$0xff]  ;;  %1121 = vmatpush.msra.mxu2 %v271_v34  ;;  %1035 = vmatpush.msrb.mxu1 %v406_v35  ;;  %v299_v7 = vld [vmem:[#allocation2 + $0x6d8] sm:$0xff]  ;;  %v1278_v34 = vand.u32 2147483647, %v1881_v4 }
 0x133   :  { %v1851_v38 = vld [vmem:[%s1990_s0 + $0x30] sm:$0xff]  ;;  %1076 = vmatpush.msrb.mxu3 %v530_v13  ;;  %1082 = vmatpush.msra.mxu0 %v139_v40  ;;  %v99_v35 = vld [vmem:[#allocation2 + $0x98] sm:$0xff]  ;;  %v1273_v40 = vadd.f32 %v1610_v20, %v1272_v33 }
 0x134   :  { %1057 = vmatmul.f32.vlgmr.msrb.gmra.mxu2 %v1851_v38  ;;  %v402_v46 = vld [vmem:[#allocation2 + $0xa10] sm:$0xff]  ;;  %1077 = vmatmul.f32.vlgmr.msrb.gmra.mxu3 %v1868_v49  ;;  %v227_v36 = vld [vmem:[#allocation2 + $0x498] sm:$0xff]  ;;  %vm1279_vm3 = vcmp.eq.f32.partialorder %v1278_v34, 8.507059e+37 }
 0x135   :  { %1122 = vmatpush.msra.mxu2 %v267_v42  ;;  %1141 = vmatpush.msra.mxu3 %v335_v43  ;;  %v171_v37 = vld [vmem:[#allocation2 + $0x2d8] sm:$0xff] }
 0x136   :  { %1036 = vmatpush.msrb.mxu1 %v402_v46  ;;  %1083 = vmatpush.msra.mxu0 %v135_v47  ;;  %v295_v13 = vld [vmem:[#allocation2 + $0x6b8] sm:$0xff]  ;;  %v1281_v46 = vor.u32 1.1754944e-38, %v1280_v6 }
 0x137   :  { %1037 = vmatmul.f32.vlgmr.msrb.gmra.mxu1 %v1877_v59  ;;  %1123 = vmatpush.msra.mxu2 %v263_v52  ;;  %v95_v42 = vld [vmem:[#allocation2 + $0x78] sm:$0xff] }
 0x138   :  { %1101 = vmatpush.msra.mxu1 %v207_v53  ;;  %1142 = vmatpush.msra.mxu3 %v331_v54  ;;  %v223_v43 = vld [vmem:[#allocation2 + $0x478] sm:$0xff]  ;;  %v1277_v53 = vsel %vm1276_vm2, %v1610_v20, %v1273_v40 }
 0x139   :  { %1084 = vmatpush.msra.mxu0 %v131_v57  ;;  %1124 = vmatpush.msra.mxu2 %v259_v58  ;;  %v167_v47 = vld [vmem:[#allocation2 + $0x2b8] sm:$0xff]  ;;  %v1891_v58 = vsel %vm1279_vm3, %v1281_v46, %v1277_v53 }
 0x13a   :  { %1102 = vmatpush.msra.mxu1 %v203_v60  ;;  %1143 = vmatpush.msra.mxu3 %v327_v61  ;;  %v291_v52 = vld [vmem:[#allocation2 + $0x698] sm:$0xff]  ;;  %v1365_v60 = vsub.f32 0.0, %v1872_v55 }
 0x13b   :  { %1085 = vmatpush.msra.mxu0 %v127_v63  ;;  %1125 = vmatpush.msra.mxu2 %v255_v0  ;;  %v91_v54 = vld [vmem:[#allocation2 + $0x58] sm:$0xff]  ;;  %v1329_v63 = vmul.f32 1.0614054, %v1891_v58 }
 0x13c   :  { %1103 = vmatpush.msra.mxu1 %v199_v2  ;;  %1144 = vmatpush.msra.mxu3 %v323_v3  ;;  %v219_v57 = vld [vmem:[#allocation2 + $0x458] sm:$0xff] }
 0x13d   :  { %1086 = vmatpush.msra.mxu0 %v123_v5  ;;  %1126 = vmatpush.msra.mxu2 %v251_v8  ;;  %v163_v61 = vld [vmem:[#allocation2 + $0x298] sm:$0xff]  ;;  %v1592_v5 = vadd.f32 -1.4531521, %v1329_v63  ;;  %v594_v63 = vperm.slane %v1821_v39, 1 }
 0x13e   :  { %1104 = vmatpush.msra.mxu1 %v195_v9  ;;  %1145 = vmatpush.msra.mxu3 %v319_v10  ;;  %v287_v62 = vld [vmem:[#allocation2 + $0x678] sm:$0xff]  ;;  %v1369_v10 = vmul.f32 %v1365_v60, %v1872_v55 }
 0x13f   :  { %1087 = vmatpush.msra.mxu0 %v119_v11  ;;  %1127 = vmatpush.msra.mxu2 %v247_v12  ;;  %v87_v0 = vld [vmem:[#allocation2 + $0x38] sm:$0xff] }
 0x140   :  { %1105 = vmatpush.msra.mxu1 %v191_v14  ;;  %1146 = vmatpush.msra.mxu3 %v315_v15  ;;  %v215_v2 = vld [vmem:[#allocation2 + $0x438] sm:$0xff]  ;;  %v1337_v14 = vmul.f32 %v1592_v5, %v1891_v58  ;;  %v1373_v55 = vmul.f32 1.442695, %v1369_v10  ;;  %v1717_v5 = vmov 1.0  }
 0x141   :  { %1088 = vmatpush.msra.mxu0 %v115_v16  ;;  %1128 = vmatpush.msra.mxu2 %v243_v45  ;;  %v159_v3 = vld [vmem:[#allocation2 + $0x278] sm:$0xff] }
 0x142   :  { %1106 = vmatpush.msra.mxu1 %v187_v17  ;;  %1147 = vmatpush.msra.mxu3 %v311_v19  ;;  %v283_v4 = vld [vmem:[#allocation2 + $0x658] sm:$0xff]  ;;  %v1341_v19 = vadd.f32 1.4214138, %v1337_v14  ;;  %1611 = vpow2.f32 %v1373_v55 }
 0x143   :  { %1089 = vmatpush.msra.mxu0 %v111_v50  ;;  %1129 = vmatpush.msra.mxu2 %v239_v51  ;;  %v83_v8 = vld [vmem:[#allocation2 + $0x18] sm:$0xff] }
 0x144   :  { %1107 = vmatpush.msra.mxu1 %v183_v56  ;;  %1148 = vmatpush.msra.mxu3 %v307_v22  ;;  %v211_v9 = vld [vmem:[#allocation2 + $0x418] sm:$0xff]  ;;  %v1345_v22 = vmul.f32 %v1341_v19, %v1891_v58  ;;  %v778_v14 = vpop.f32.mrf.mxu0 }
 0x145   :  { %1090 = vmatpush.msra.mxu0 %v107_v25  ;;  %1130 = vmatpush.msra.mxu2 %v235_v26  ;;  %v155_v11 = vld [vmem:[#allocation2 + $0x258] sm:$0xff] }
 0x146   :  { %1108 = vmatpush.msra.mxu1 %v179_v27  ;;  %1149 = vmatpush.msra.mxu3 %v303_v1  ;;  %v279_v12 = vld [vmem:[#allocation2 + $0x638] sm:$0xff]  ;;  %v1596_v1 = vadd.f32 -0.28449672, %v1345_v22  ;;  %v798_v22 = vpop.f32.mrf.mxu1 }
 0x147   :  { %1091 = vmatpush.msra.mxu0 %v103_v30  ;;  %1131 = vmatpush.msra.mxu2 %v231_v31  ;;  %v399_v15 = vld [vmem:[#allocation2 + $0x9f8] sm:$0xff] }
 0x148   :  { %1109 = vmatpush.msra.mxu1 %v175_v32  ;;  %1150 = vmatpush.msra.mxu3 %v299_v7  ;;  %v527_v16 = vld [vmem:[#allocation2 + $0xdf8] sm:$0xff]  ;;  %v1353_v32 = vmul.f32 %v1596_v1, %v1891_v58 }
 0x149   :  { %1092 = vmatpush.msra.mxu0 %v99_v35  ;;  %1132 = vmatpush.msra.mxu2 %v227_v36  ;;  %v151_v45 = vld [vmem:[#allocation2 + $0x238] sm:$0xff]  ;;  %v818_v1 = vpop.f32.mrf.mxu2 }
 0x14a   :  { %1110 = vmatpush.msra.mxu1 %v171_v37  ;;  %1151 = vmatpush.msra.mxu3 %v295_v13  ;;  %v275_v17 = vld [vmem:[#allocation2 + $0x618] sm:$0xff]  ;;  %v1357_v36 = vadd.f32 0.2548296, %v1353_v32 }
 0x14b   :  { %1093 = vmatpush.msra.mxu0 %v95_v42  ;;  %1133 = vmatpush.msra.mxu2 %v223_v43  ;;  %v395_v50 = vld [vmem:[#allocation2 + $0x9d8] sm:$0xff] }
 0x14c   :  { %1111 = vmatpush.msra.mxu1 %v167_v47  ;;  %1152 = vmatpush.msra.mxu3 %v291_v52  ;;  %v523_v51 = vld [vmem:[#allocation2 + $0xdd8] sm:$0xff]  ;;  %v1361_v43 = vmul.f32 %v1357_v36, %v1891_v58  ;;  %v1612_v52 = vpop.eup %1611 }
 0x14d   :  { %1094 = vmatpush.msra.mxu0 %v91_v54  ;;  %1134 = vmatpush.msra.mxu2 %v219_v57  ;;  %v591_v20 = vld [vmem:[#allocation2 + $0xff8] sm:$0xff] }
 0x14e   :  { %1112 = vmatpush.msra.mxu1 %v163_v61  ;;  %1153 = vmatpush.msra.mxu3 %v287_v62  ;;  %v147_v56 = vld [vmem:[#allocation2 + $0x218] sm:$0xff]  ;;  %v1381_v57 = vmul.f32 %v1612_v52, %v1361_v43 }
 0x14f   :  { %1095 = vmatpush.msra.mxu0 %v87_v0  ;;  %1135 = vmatpush.msra.mxu2 %v215_v2  ;;  %v391_v24 = vld [vmem:[#allocation2 + $0x9b8] sm:$0xff] }
 0x150   :  { %1113 = vmatpush.msra.mxu1 %v159_v3  ;;  %1154 = vmatpush.msra.mxu3 %v283_v4  ;;  %v463_v25 = vld [vmem:[#allocation2 + $0xbf8] sm:$0xff]  ;;  %v1385_v0 = vsub.f32 1.0, %v1381_v57  ;;  %v858_v43 = vpop.f32.mrf.mxu0 }
 0x151   :  { %1096 = vmatpush.msra.mxu0 %v83_v8  ;;  %1136 = vmatpush.msra.mxu2 %v211_v9  ;;  %v519_v26 = vld [vmem:[#allocation2 + $0xdb8] sm:$0xff]  ;;  %v1253_v8 = vsel %vm1249_vm4, -1.0, %v1717_v5 }
 0x152   :  { %1114 = vmatpush.msra.mxu1 %v155_v11  ;;  %1155 = vmatpush.msra.mxu3 %v279_v12  ;;  %v587_v27 = vld [vmem:[#allocation2 + $0xfd8] sm:$0xff]  ;;  %v1389_v39 = vmul.f32 %v1385_v0, %v1253_v8 }
 0x153   :  { %1161 = vmatpush.msrb.mxu0 %v399_v15  ;;  %1201 = vmatpush.msrb.mxu2 %v527_v16  ;;  %v387_v29 = vld [vmem:[#allocation2 + $0x998] sm:$0xff] }
 0x154   :  { %1115 = vmatpush.msra.mxu1 %v151_v45  ;;  %1156 = vmatpush.msra.mxu3 %v275_v17  ;;  %v459_v30 = vld [vmem:[#allocation2 + $0xbd8] sm:$0xff]  ;;  %v779_v45 = vadd.f32 %v778_v14, %v594_v63  ;;  %v1241_v17 = vmul.f32 0.5, %v1854_v41  ;;  %v1393_v19 = vadd.f32 1.0, %v1389_v39  ;;  %v1444_v39 = vld [vmem:[#allocation4 + $0x68] sm:$0xff] }
 0x155   :  { %1162 = vmatpush.msrb.mxu0 %v395_v50  ;;  %1202 = vmatpush.msrb.mxu2 %v523_v51  ;;  %v515_v31 = vld [vmem:[#allocation2 + $0xd98] sm:$0xff] }
 0x156   :  { %1221 = vmatpush.msrb.mxu3 %v591_v20  ;;  %1116 = vmatpush.msra.mxu1 %v147_v56  ;;  %v583_v6 = vld [vmem:[#allocation2 + $0xfb8] sm:$0xff] }
 0x157   :  { %1163 = vmatpush.msrb.mxu0 %v391_v24  ;;  %1203 = vmatpush.msrb.mxu2 %v519_v26  ;;  %v383_v7 = vld [vmem:[#allocation2 + $0x978] sm:$0xff]  ;;  %v1397_v24 = vmul.f32 %v1393_v19, %v1241_v17  ;;  %v1440_v17 = vld [vmem:[#allocation4 + $0x48] sm:$0xff] }
 0x158   :  { %1181 = vmatpush.msrb.mxu1 %v463_v25  ;;  %1222 = vmatpush.msrb.mxu3 %v587_v27  ;;  %v455_v33 = vld [vmem:[#allocation2 + $0xbb8] sm:$0xff]  ;;  %v799_v27 = vadd.f32 %v798_v22, %v779_v45  ;;  %v1461_v45 = vld [vmem:[#allocation4 + $0xf0] sm:$0xff]  ;;  %v1460_v19 = vld [vmem:[#allocation4 + $0xe8] sm:$0xff] }
 0x159   :  { %1164 = vmatpush.msrb.mxu0 %v387_v29  ;;  %v511_v34 = vld [vmem:[#allocation2 + $0xd78] sm:$0xff]  ;;  %1204 = vmatpush.msrb.mxu2 %v515_v31  ;;  %v1457_v22 = vld [vmem:[#allocation4 + $0xd0] sm:$0xff] }
 0x15a   :  { %1182 = vmatpush.msrb.mxu1 %v459_v30  ;;  %v579_v35 = vld [vmem:[#allocation2 + $0xf98] sm:$0xff]  ;;  %1223 = vmatpush.msrb.mxu3 %v583_v6  ;;  %v819_v32 = vadd.f32 %v818_v1, %v799_v27 }
 0x15b   :  { %v379_v37 = vld [vmem:[#allocation2 + $0x958] sm:$0xff]  ;;  %1165 = vmatpush.msrb.mxu0 %v383_v7  ;;  %1205 = vmatpush.msrb.mxu2 %v511_v34  ;;  %v838_v34 = vpop.f32.mrf.mxu3 }
 0x15c   :  { %v451_v13 = vld [vmem:[#allocation2 + $0xb98] sm:$0xff]  ;;  %1183 = vmatpush.msrb.mxu1 %v455_v33  ;;  %1224 = vmatpush.msrb.mxu3 %v579_v35  ;;  %v839_v36 = vadd.f32 %v838_v34, %v819_v32 }
 0x15d   :  { %v507_v40 = vld [vmem:[#allocation2 + $0xd58] sm:$0xff]  ;;  %1166 = vmatpush.msrb.mxu0 %v379_v37  ;;  %1137 = vmatmul.f32.vlgmr.msra.gmra.mxu2 %v1827_v18 }
 0x15e   :  { %v575_v42 = vld [vmem:[#allocation2 + $0xf78] sm:$0xff]  ;;  %1184 = vmatpush.msrb.mxu1 %v451_v13  ;;  %1206 = vmatpush.msrb.mxu2 %v507_v40 }
 0x15f   :  { %v375_v46 = vld [vmem:[#allocation2 + $0x938] sm:$0xff]  ;;  %1225 = vmatpush.msrb.mxu3 %v575_v42  ;;  %1097 = vmatmul.f32.vlgmr.msra.gmra.mxu0 %v1833_v21 }
 0x160   :  { %v447_v47 = vld [vmem:[#allocation2 + $0xb78] sm:$0xff]  ;;  %1167 = vmatpush.msrb.mxu0 %v375_v46  ;;  %1157 = vmatmul.f32.vlgmr.msra.gmra.mxu3 %v1839_v23 }
 0x161   :  { %v503_v53 = vld [vmem:[#allocation2 + $0xd38] sm:$0xff]  ;;  %1185 = vmatpush.msrb.mxu1 %v447_v47  ;;  %v859_v47 = vadd.f32 %v858_v43, %v839_v36  ;;  %v1452_v36 = vld [vmem:[#allocation4 + $0xa8] sm:$0xff] }
 0x162   :  { %v571_v54 = vld [vmem:[#allocation2 + $0xf58] sm:$0xff]  ;;  %1207 = vmatpush.msrb.mxu2 %v503_v53  ;;  %1117 = vmatmul.f32.vlgmr.msra.gmra.mxu1 %v1845_v28  ;;  %v1445_v28 = vld [vmem:[#allocation4 + $0x70] sm:$0xff]  ;;  %v1432_v43 = vld [vmem:[#allocation4 + $0x8] sm:$0xff] }
 0x163   :  { %v371_v60 = vld [vmem:[#allocation2 + $0x918] sm:$0xff]  ;;  %1226 = vmatpush.msrb.mxu3 %v571_v54  ;;  %v918_v8 = vpop.f32.mrf.mxu3 }
 0x164   :  { %v443_v61 = vld [vmem:[#allocation2 + $0xb58] sm:$0xff]  ;;  %1168 = vmatpush.msrb.mxu0 %v371_v60 }
 0x165   :  { %v499_v62 = vld [vmem:[#allocation2 + $0xd18] sm:$0xff]  ;;  %1186 = vmatpush.msrb.mxu1 %v443_v61  ;;  %v878_v61 = vpop.f32.mrf.mxu1 }
 0x166   :  { %v567_v58 = vld [vmem:[#allocation2 + $0xf38] sm:$0xff]  ;;  %1208 = vmatpush.msrb.mxu2 %v499_v62  ;;  %v898_v62 = vpop.f32.mrf.mxu2  ;;  %v879_v63 = vadd.f32 %v878_v61, %v859_v47  ;;  %v1448_v61 = vld [vmem:[#allocation4 + $0x88] sm:$0xff] }
 0x167   :  { %v367_v2 = vld [vmem:[#allocation2 + $0x8f8] sm:$0xff]  ;;  %1227 = vmatpush.msrb.mxu3 %v567_v58 }
 0x168   :  { %v439_v3 = vld [vmem:[#allocation2 + $0xb38] sm:$0xff]  ;;  %1169 = vmatpush.msrb.mxu0 %v367_v2 }
 0x169   :  { %v1905_v4 = vld [vmem:[%s1992_s2 + $0x1] ss:$8 sm:$0xf]  ;;  %1187 = vmatpush.msrb.mxu1 %v439_v3  ;;  %v1913_v48 = vld [vmem:[%s1992_s2 + $0x2] ss:$8 sm:$0xf]  ;;  %v899_v3 = vadd.f32 %v898_v62, %v879_v63 }
 0x16a   :  { %v495_v9 = vld [vmem:[#allocation2 + $0xcf8] sm:$0xff]  ;;  %v1402_v50 = vperm.slane %v1905_v4, 0  ;;  %v1415_v41 = vperm.slane %v1913_v48, 0 }
 0x16b   :  { %v563_v10 = vld [vmem:[#allocation2 + $0xf18] sm:$0xff]  ;;  %1209 = vmatpush.msrb.mxu2 %v495_v9 }
 0x16c   :  { %v363_v11 = vld [vmem:[#allocation2 + $0x8d8] sm:$0xff]  ;;  %1228 = vmatpush.msrb.mxu3 %v563_v10  ;;  %v1410_v31 = vmul.f32 %v1402_v50, %v1397_v24  ;;  %v1929_v10 = vadd.f32 %v918_v8, %v899_v3  ;;  %v1459_v50 = vld [vmem:[#allocation4 + $0xe0] sm:$0xff] }
 0x16d   :  { %v435_v12 = vld [vmem:[#allocation2 + $0xb18] sm:$0xff]  ;;  %1170 = vmatpush.msrb.mxu0 %v363_v11 }
 0x16e   :  { %v491_v15 = vld [vmem:[#allocation2 + $0xcd8] sm:$0xff]  ;;  %1188 = vmatpush.msrb.mxu1 %v435_v12  ;;  %v1918_v37 = vadd.f32 %v1415_v41, %v1410_v31  ;;  %v1934_v11 = vmul.f32 0.70710677, %v1929_v10  ;;  %v1435_v41 = vld [vmem:[#allocation4 + $0x20] sm:$0xff] }
 0x16f   :  { %v559_v16 = vld [vmem:[#allocation2 + $0xef8] sm:$0xff]  ;;  %1210 = vmatpush.msrb.mxu2 %v491_v15 }
 0x170   :  { %v359_v51 = vld [vmem:[#allocation2 + $0x8b8] sm:$0xff]  ;;  %1229 = vmatpush.msrb.mxu3 %v559_v16  ;;  %1427 = vst [vmem:[%s1996_s6] sm:$0xff] %v1918_v37  ;;  %v1938_v12 = vand.u32 2147483647, %v1934_v11  ;;  %vm1250_vm9 = vcmp.lt.f32.partialorder %v1934_v11, 0.0 }
 0x171   :  { %v431_v55 = vld [vmem:[#allocation2 + $0xaf8] sm:$0xff]  ;;  %1171 = vmatpush.msrb.mxu0 %v359_v51 }
 0x172   :  { %v487_v20 = vld [vmem:[#allocation2 + $0xcb8] sm:$0xff]  ;;  %1189 = vmatpush.msrb.mxu1 %v431_v55  ;;  %v1262_v15 = vmul.f32 0.3275911, %v1938_v12 }
 0x173   :  { %v555_v56 = vld [vmem:[#allocation2 + $0xed8] sm:$0xff]  ;;  %1211 = vmatpush.msrb.mxu2 %v487_v20 }
 0x174   :  { %v355_v25 = vld [vmem:[#allocation2 + $0x898] sm:$0xff]  ;;  %1230 = vmatpush.msrb.mxu3 %v555_v56  ;;  %v1437_v56 = vld [vmem:[#allocation4 + $0x30] sm:$0xff] }
 0x175   :  { %v427_v26 = vld [vmem:[#allocation2 + $0xad8] sm:$0xff]  ;;  %1172 = vmatpush.msrb.mxu0 %v355_v25  ;;  %v1436_v25 = vld [vmem:[#allocation4 + $0x28] sm:$0xff] }
 0x176   :  { %v483_v29 = vld [vmem:[#allocation2 + $0xc98] sm:$0xff]  ;;  %1190 = vmatpush.msrb.mxu1 %v427_v26  ;;  %v1456_v26 = vld [vmem:[#allocation4 + $0xc8] sm:$0xff] }
 0x177   :  { %v551_v30 = vld [vmem:[#allocation2 + $0xeb8] sm:$0xff]  ;;  %1212 = vmatpush.msrb.mxu2 %v483_v29  ;;  %v1455_v29 = vld [vmem:[#allocation4 + $0xc0] sm:$0xff] }
 0x178   :  { %v351_v6 = vld [vmem:[#allocation2 + $0x878] sm:$0xff]  ;;  %1231 = vmatpush.msrb.mxu3 %v551_v30 }
 0x179   :  { %v423_v7 = vld [vmem:[#allocation2 + $0xab8] sm:$0xff]  ;;  %1173 = vmatpush.msrb.mxu0 %v351_v6 }
 0x17a   :  { %v479_v33 = vld [vmem:[#allocation2 + $0xc78] sm:$0xff]  ;;  %1191 = vmatpush.msrb.mxu1 %v423_v7 }
 0x17b   :  { %v547_v35 = vld [vmem:[#allocation2 + $0xe98] sm:$0xff]  ;;  %1213 = vmatpush.msrb.mxu2 %v479_v33  ;;  %v1453_v33 = vld [vmem:[#allocation4 + $0xb0] sm:$0xff] }
 0x17c   :  { %v347_v13 = vld [vmem:[#allocation2 + $0x858] sm:$0xff]  ;;  %1232 = vmatpush.msrb.mxu3 %v547_v35  ;;  %v1433_v35 = vld [vmem:[#allocation4 + $0x10] sm:$0xff]  ;;  %v958_v11 = vpop.f32.mrf.mxu1 }
 0x17d   :  { %v419_v40 = vld [vmem:[#allocation2 + $0xa98] sm:$0xff]  ;;  %1174 = vmatpush.msrb.mxu0 %v347_v13 }
 0x17e   :  { %v475_v42 = vld [vmem:[#allocation2 + $0xc58] sm:$0xff]  ;;  %1192 = vmatpush.msrb.mxu1 %v419_v40 }
 0x17f   :  { %v543_v46 = vld [vmem:[#allocation2 + $0xe78] sm:$0xff]  ;;  %1214 = vmatpush.msrb.mxu2 %v475_v42  ;;  %v1366_v42 = vsub.f32 0.0, %v1938_v12 }
 0x180   :  { %v343_v18 = vld [vmem:[#allocation2 + $0x838] sm:$0xff]  ;;  %1233 = vmatpush.msrb.mxu3 %v543_v46  ;;  %v1451_v46 = vld [vmem:[#allocation4 + $0xa0] sm:$0xff] }
 0x181   :  { %v415_v52 = vld [vmem:[#allocation2 + $0xa78] sm:$0xff]  ;;  %1175 = vmatpush.msrb.mxu0 %v343_v18  ;;  %v1431_v18 = vld [vmem:[#allocation4] sm:$0xff] }
 0x182   :  { %v471_v53 = vld [vmem:[#allocation2 + $0xc38] sm:$0xff]  ;;  %1193 = vmatpush.msrb.mxu1 %v415_v52 }
 0x183   :  { %v539_v54 = vld [vmem:[#allocation2 + $0xe58] sm:$0xff]  ;;  %1215 = vmatpush.msrb.mxu2 %v471_v53 }
 0x184   :  { %v339_v57 = vld [vmem:[#allocation2 + $0x818] sm:$0xff]  ;;  %1234 = vmatpush.msrb.mxu3 %v539_v54  ;;  %v1370_v54 = vmul.f32 %v1366_v42, %v1938_v12 }
 0x185   :  { %v411_v60 = vld [vmem:[#allocation2 + $0xa58] sm:$0xff]  ;;  %1176 = vmatpush.msrb.mxu0 %v339_v57  ;;  %v1449_v57 = vld [vmem:[#allocation4 + $0x90] sm:$0xff] }
 0x186   :  { %v467_v21 = vld [vmem:[#allocation2 + $0xc18] sm:$0xff]  ;;  %1194 = vmatpush.msrb.mxu1 %v411_v60  ;;  %1177 = vmatmul.f32.vlgmr.msrb.gmra.mxu0 %v1859_v44  ;;  %v1266_v44 = vadd.f32 1.0, %v1262_v15 }
 0x187   :  { %v535_v58 = vld [vmem:[#allocation2 + $0xe38] sm:$0xff]  ;;  %1216 = vmatpush.msrb.mxu2 %v467_v21  ;;  %v1375_v21 = vmul.f32 1.442695, %v1370_v54 }
 0x188   :  { %v1446_v23 = vld [vmem:[#allocation4 + $0x78] sm:$0xff]  ;;  %1235 = vmatpush.msrb.mxu3 %v535_v58  ;;  %1217 = vmatmul.f32.vlgmr.msrb.gmra.mxu2 %v1851_v38  ;;  %v1443_v38 = vld [vmem:[#allocation4 + $0x60] sm:$0xff]  ;;  %1613 = vrcp.f32 %v1266_v44  ;;  %v1295_v1 = vand.u32 2147483648, %v1266_v44  ;;  %vm1289_vm5 = vweird.f32 %v1266_v44  ;;  %v1293_v31 = vand.u32 2147483647, %v1266_v44 }
 0x189   :  { %v407_v0 = vld [vmem:[#allocation2 + $0xa38] sm:$0xff]  ;;  %1499 = vmatpush.msra.mxu0 %v1446_v23  ;;  %v1447_v58 = vld [vmem:[#allocation4 + $0x80] sm:$0xff]  ;;  %1615 = vpow2.f32 %v1375_v21 }
 0x18a   :  { %v531_v2 = vld [vmem:[#allocation2 + $0xe18] sm:$0xff]  ;;  %1195 = vmatpush.msrb.mxu1 %v407_v0  ;;  %v1296_v34 = vor.u32 1.1754944e-38, %v1295_v1  ;;  %vm1294_vm8 = vcmp.eq.f32.partialorder %v1293_v31, 8.507059e+37  ;;  %v1477_v31 = vld [vmem:[#allocation4 + $0x170] sm:$0xff] }
 0x18b   :  { %v403_v9 = vld [vmem:[#allocation2 + $0xa18] sm:$0xff]  ;;  %1236 = vmatpush.msrb.mxu3 %v531_v2  ;;  %1500 = vmatpush.msra.mxu0 %v1445_v28 }
 0x18c   :  { %1237 = vmatmul.f32.vlgmr.msrb.gmra.mxu3 %v1868_v49  ;;  %1196 = vmatpush.msrb.mxu1 %v403_v9  ;;  %v1442_v14 = vld [vmem:[#allocation4 + $0x58] sm:$0xff]  ;;  %v1441_v49 = vld [vmem:[#allocation4 + $0x50] sm:$0xff] }
 0x18d   :  { %1197 = vmatmul.f32.vlgmr.msrb.gmra.mxu1 %v1877_v59  ;;  %1501 = vmatpush.msra.mxu0 %v1444_v39  ;;  %v1462_v16 = vld [vmem:[#allocation4 + $0xf8] sm:$0xff]  ;;  %v1439_v59 = vld [vmem:[#allocation4 + $0x40] sm:$0xff] }
 0x18e   :  { %1519 = vmatpush.msra.mxu1 %v1462_v16  ;;  %v1438_v51 = vld [vmem:[#allocation4 + $0x38] sm:$0xff]  ;;  %v1614_v20 = vpop.eup %1613  ;;  %v1242_v16 = vmul.f32 0.5, %v1929_v10 }
 0x18f   :  { %1502 = vmatpush.msra.mxu0 %v1443_v38  ;;  %v1458_v55 = vld [vmem:[#allocation4 + $0xd8] sm:$0xff]  ;;  %v1285_v24 = vmul.f32 %v1614_v20, %v1266_v44  ;;  %vm1290_vm6 = vweird.f32 %v1614_v20  ;;  %v1616_v8 = vpop.eup %1615  ;;  %v1254_v38 = vsel %vm1250_vm9, -1.0, %v1717_v5 }
 0x190   :  { %1520 = vmatpush.msra.mxu1 %v1461_v45  ;;  %v1434_v6 = vld [vmem:[#allocation4 + $0x18] sm:$0xff]  ;;  %vm1291_vm7 = vmor %vm1289_vm5, %vm1290_vm6 }
 0x191   :  { %1503 = vmatpush.msra.mxu0 %v1442_v14  ;;  %v1286_v27 = vsub.f32 1.0, %v1285_v24  ;;  %v1454_v32 = vld [vmem:[#allocation4 + $0xb8] sm:$0xff]  ;;  %v938_v14 = vpop.f32.mrf.mxu0 }
 0x192   :  { %1521 = vmatpush.msra.mxu1 %v1460_v19  ;;  %v1450_v52 = vld [vmem:[#allocation4 + $0x98] sm:$0xff] }
 0x193   :  { %1504 = vmatpush.msra.mxu0 %v1441_v49  ;;  %v1287_v30 = vmul.f32 %v1614_v20, %v1286_v27  ;;  %v1403_v49 = vperm.slane %v1905_v4, 1 }
 0x194   :  { %1522 = vmatpush.msra.mxu1 %v1459_v50 }
 0x195   :  { %1505 = vmatpush.msra.mxu0 %v1440_v17  ;;  %v1288_v7 = vadd.f32 %v1614_v20, %v1287_v30 }
 0x196   :  { %1523 = vmatpush.msra.mxu1 %v1458_v55  ;;  %v998_v55 = vpop.f32.mrf.mxu3 }
 0x197   :  { %1506 = vmatpush.msra.mxu0 %v1439_v59  ;;  %v1292_v13 = vsel %vm1291_vm7, %v1614_v20, %v1288_v7  ;;  %v1416_v59 = vperm.slane %v1913_v48, 1 }
 0x198   :  { %1524 = vmatpush.msra.mxu1 %v1457_v22  ;;  %v1297_v40 = vsel %vm1294_vm8, %v1296_v34, %v1292_v13  ;;  %v1472_v13 = vld [vmem:[#allocation4 + $0x148] sm:$0xff] }
 0x199   :  { %1507 = vmatpush.msra.mxu0 %v1438_v51  ;;  %v1330_v47 = vmul.f32 1.0614054, %v1297_v40 }
 0x19a   :  { %1525 = vmatpush.msra.mxu1 %v1456_v26 }
 0x19b   :  { %1508 = vmatpush.msra.mxu0 %v1437_v56  ;;  %v1593_v53 = vadd.f32 -1.4531521, %v1330_v47  ;;  %v1469_v47 = vld [vmem:[#allocation4 + $0x130] sm:$0xff] }
 0x19c   :  { %1526 = vmatpush.msra.mxu1 %v1455_v29  ;;  %v1478_v29 = vld [vmem:[#allocation4 + $0x178] sm:$0xff] }
 0x19d   :  { %1509 = vmatpush.msra.mxu0 %v1436_v25  ;;  %v1338_v60 = vmul.f32 %v1593_v53, %v1297_v40  ;;  %1539 = vmatpush.msra.mxu2 %v1478_v29  ;;  %v1468_v53 = vld [vmem:[#allocation4 + $0x128] sm:$0xff] }
 0x19e   :  { %1527 = vmatpush.msra.mxu1 %v1454_v32  ;;  %v1476_v32 = vld [vmem:[#allocation4 + $0x168] sm:$0xff] }
 0x19f   :  { %1510 = vmatpush.msra.mxu0 %v1435_v41  ;;  %v1342_v62 = vadd.f32 1.4214138, %v1338_v60  ;;  %1540 = vmatpush.msra.mxu2 %v1477_v31  ;;  %v1467_v60 = vld [vmem:[#allocation4 + $0x120] sm:$0xff] }
 0x1a0   :  { %1528 = vmatpush.msra.mxu1 %v1453_v33  ;;  %v1475_v33 = vld [vmem:[#allocation4 + $0x160] sm:$0xff] }
 0x1a1   :  { %1511 = vmatpush.msra.mxu0 %v1434_v6  ;;  %v1346_v63 = vmul.f32 %v1342_v62, %v1297_v40  ;;  %1541 = vmatpush.msra.mxu2 %v1476_v32  ;;  %v1466_v62 = vld [vmem:[#allocation4 + $0x118] sm:$0xff] }
 0x1a2   :  { %1529 = vmatpush.msra.mxu1 %v1452_v36  ;;  %v1473_v36 = vld [vmem:[#allocation4 + $0x150] sm:$0xff] }
 0x1a3   :  { %1512 = vmatpush.msra.mxu0 %v1433_v35  ;;  %v1597_v23 = vadd.f32 -0.28449672, %v1346_v63  ;;  %1542 = vmatpush.msra.mxu2 %v1475_v33  ;;  %v1474_v35 = vld [vmem:[#allocation4 + $0x158] sm:$0xff]  ;;  %v1465_v63 = vld [vmem:[#allocation4 + $0x110] sm:$0xff] }
 0x1a4   :  { %1530 = vmatpush.msra.mxu1 %v1451_v46  ;;  %v1494_v33 = vld [vmem:[#allocation4 + $0x1f8] sm:$0xff] }
 0x1a5   :  { %1513 = vmatpush.msra.mxu0 %v1432_v43  ;;  %v1354_v0 = vmul.f32 %v1597_v23, %v1297_v40  ;;  %1543 = vmatpush.msra.mxu2 %v1474_v35  ;;  %v1470_v43 = vld [vmem:[#allocation4 + $0x138] sm:$0xff] }
 0x1a6   :  { %1531 = vmatpush.msra.mxu1 %v1450_v52  ;;  %1559 = vmatpush.msra.mxu3 %v1494_v33 }
 0x1a7   :  { %1514 = vmatpush.msra.mxu0 %v1431_v18  ;;  %v1358_v2 = vadd.f32 0.2548296, %v1354_v0  ;;  %1544 = vmatpush.msra.mxu2 %v1473_v36  ;;  %v1493_v36 = vld [vmem:[#allocation4 + $0x1f0] sm:$0xff] }
 0x1a8   :  { %1515 = vmatmul.f32.vlgmr.msra.gmra.mxu0 %v1918_v37  ;;  %1532 = vmatpush.msra.mxu1 %v1449_v57  ;;  %v1948_v37 = vld [vmem:[%s1992_s2] ss:$8 sm:$0xf]  ;;  %v978_v19 = vpop.f32.mrf.mxu2 }
 0x1a9   :  { %v1362_v3 = vmul.f32 %v1358_v2, %v1297_v40  ;;  %v595_v9 = vperm.slane %v1948_v37, 2  ;;  %1545 = vmatpush.msra.mxu2 %v1472_v13  ;;  %v1471_v40 = vld [vmem:[#allocation4 + $0x140] sm:$0xff]  ;;  %1560 = vmatpush.msra.mxu3 %v1493_v36 }
 0x1aa   :  { %1533 = vmatpush.msra.mxu1 %v1448_v61 }
 0x1ab   :  { %v1382_v28 = vmul.f32 %v1616_v8, %v1362_v3  ;;  %v939_v15 = vadd.f32 %v938_v14, %v595_v9  ;;  %1546 = vmatpush.msra.mxu2 %v1471_v40  ;;  %v1464_v3 = vld [vmem:[#allocation4 + $0x108] sm:$0xff]  ;;  %v1463_v9 = vld [vmem:[#allocation4 + $0x100] sm:$0xff] }
 0x1ac   :  { %1534 = vmatpush.msra.mxu1 %v1447_v58  ;;  %v1018_v22 = vpop.f32.mrf.mxu0 }
 0x1ad   :  { %v1386_v39 = vsub.f32 1.0, %v1382_v28  ;;  %v959_v17 = vadd.f32 %v958_v11, %v939_v15  ;;  %1547 = vmatpush.msra.mxu2 %v1470_v43 }
 0x1af   :  { %v1390_v12 = vmul.f32 %v1386_v39, %v1254_v38  ;;  %v979_v51 = vadd.f32 %v978_v19, %v959_v17  ;;  %1548 = vmatpush.msra.mxu2 %v1469_v47  ;;  %v596_v17 = vperm.slane %v1948_v37, 3 }
 0x1b1   :  { %v1394_v44 = vadd.f32 1.0, %v1390_v12  ;;  %v999_v20 = vadd.f32 %v998_v55, %v979_v51  ;;  %1549 = vmatpush.msra.mxu2 %v1468_v53  ;;  %v1489_v53 = vld [vmem:[#allocation4 + $0x1d0] sm:$0xff] }
 0x1b3   :  { %v1398_v45 = vmul.f32 %v1394_v44, %v1242_v16  ;;  %v1019_v10 = vadd.f32 %v1018_v22, %v999_v20  ;;  %1550 = vmatpush.msra.mxu2 %v1467_v60  ;;  %v1404_v22 = vperm.slane %v1905_v4, 2  ;;  %v1487_v60 = vld [vmem:[#allocation4 + $0x1c0] sm:$0xff] }
 0x1b4   :  { %v1038_v24 = vpop.f32.mrf.mxu1 }
 0x1b5   :  { %v1411_v50 = vmul.f32 %v1403_v49, %v1398_v45  ;;  %v1039_v26 = vadd.f32 %v1038_v24, %v1019_v10  ;;  %1551 = vmatpush.msra.mxu2 %v1466_v62  ;;  %v1485_v62 = vld [vmem:[#allocation4 + $0x1b0] sm:$0xff] }
 0x1b7   :  { %v1424_v56 = vadd.f32 %v1416_v59, %v1411_v50  ;;  %v1058_v25 = vpop.f32.mrf.mxu2  ;;  %v1078_v1 = vpop.f32.mrf.mxu3  ;;  %1552 = vmatpush.msra.mxu2 %v1465_v63 }
 0x1b8   :  { %v1059_v27 = vadd.f32 %v1058_v25, %v1039_v26 }
 0x1b9   :  { %1428 = vst [vmem:[%s1996_s6 + $0x8] sm:$0xff] %v1424_v56  ;;  %1535 = vmatmul.f32.vlgmr.msra.gmra.mxu1 %v1424_v56  ;;  %1553 = vmatpush.msra.mxu2 %v1464_v3  ;;  %v1482_v3 = vld [vmem:[#allocation4 + $0x198] sm:$0xff] }
 0x1ba   :  { %v1958_v41 = vadd.f32 %v1078_v1, %v1059_v27  ;;  %v1417_v27 = vperm.slane %v1913_v48, 2 }
 0x1bb   :  { %1554 = vmatpush.msra.mxu2 %v1463_v9  ;;  %v1481_v9 = vld [vmem:[#allocation4 + $0x190] sm:$0xff] }
 0x1bc   :  { %v1961_v30 = vmul.f32 0.70710677, %v1958_v41  ;;  %v1243_v20 = vmul.f32 0.5, %v1958_v41 }
 0x1be   :  { %v1259_v6 = vand.u32 2147483647, %v1961_v30  ;;  %vm1251_vm14 = vcmp.lt.f32.partialorder %v1961_v30, 0.0 }
 0x1bf   :  { %v1255_v59 = vsel %vm1251_vm14, -1.0, %v1717_v5 }
 0x1c0   :  { %v1263_v7 = vmul.f32 0.3275911, %v1259_v6  ;;  %v1367_v0 = vsub.f32 0.0, %v1259_v6 }
 0x1c2   :  { %v1267_v34 = vadd.f32 1.0, %v1263_v7  ;;  %v1371_v28 = vmul.f32 %v1367_v0, %v1259_v6 }
 0x1c4   :  { %1617 = vrcp.f32 %v1267_v34  ;;  %v1310_v52 = vand.u32 2147483648, %v1267_v34  ;;  %vm1304_vm10 = vweird.f32 %v1267_v34  ;;  %v1308_v57 = vand.u32 2147483647, %v1267_v34 }
 0x1c5   :  { %v1377_v12 = vmul.f32 1.442695, %v1371_v28 }
 0x1c6   :  { %v1311_v21 = vor.u32 1.1754944e-38, %v1310_v52  ;;  %vm1309_vm13 = vcmp.eq.f32.partialorder %v1308_v57, 8.507059e+37  ;;  %v1488_v57 = vld [vmem:[#allocation4 + $0x1c8] sm:$0xff] }
 0x1c7   :  { %1619 = vpow2.f32 %v1377_v12 }
 0x1ca   :  { %v1618_v42 = vpop.eup %1617 }
 0x1cb   :  { %v1300_v46 = vmul.f32 %v1618_v42, %v1267_v34  ;;  %vm1305_vm11 = vweird.f32 %v1618_v42 }
 0x1cc   :  { %vm1306_vm12 = vmor %vm1304_vm10, %vm1305_vm11 }
 0x1cd   :  { %v1301_v18 = vsub.f32 1.0, %v1300_v46  ;;  %v1620_v11 = vpop.eup %1619  ;;  %v1491_v46 = vld [vmem:[#allocation4 + $0x1e0] sm:$0xff] }
 0x1cf   :  { %v1302_v54 = vmul.f32 %v1618_v42, %v1301_v18  ;;  %v1490_v18 = vld [vmem:[#allocation4 + $0x1d8] sm:$0xff] }
 0x1d1   :  { %v1303_v61 = vadd.f32 %v1618_v42, %v1302_v54 }
 0x1d3   :  { %v1307_v58 = vsel %vm1306_vm12, %v1618_v42, %v1303_v61  ;;  %v1492_v42 = vld [vmem:[#allocation4 + $0x1e8] sm:$0xff]  ;;  %v1486_v61 = vld [vmem:[#allocation4 + $0x1b8] sm:$0xff] }
 0x1d4   :  { %v1312_v23 = vsel %vm1309_vm13, %v1311_v21, %v1307_v58  ;;  %1561 = vmatpush.msra.mxu3 %v1492_v42  ;;  %v1484_v58 = vld [vmem:[#allocation4 + $0x1a8] sm:$0xff] }
 0x1d5   :  { %v1331_v2 = vmul.f32 1.0614054, %v1312_v23 }
 0x1d6   :  { %1562 = vmatpush.msra.mxu3 %v1491_v46 }
 0x1d7   :  { %v1594_v8 = vadd.f32 -1.4531521, %v1331_v2 }
 0x1d8   :  { %1563 = vmatpush.msra.mxu3 %v1490_v18 }
 0x1d9   :  { %v1339_v39 = vmul.f32 %v1594_v8, %v1312_v23 }
 0x1da   :  { %1564 = vmatpush.msra.mxu3 %v1489_v53 }
 0x1db   :  { %v1343_v38 = vadd.f32 1.4214138, %v1339_v39 }
 0x1dc   :  { %v1098_v51 = vpop.f32.mrf.mxu0  ;;  %1565 = vmatpush.msra.mxu3 %v1488_v57 }
 0x1dd   :  { %v1347_v14 = vmul.f32 %v1343_v38, %v1312_v23  ;;  %v1099_v55 = vadd.f32 %v1098_v51, %v596_v17  ;;  %v1480_v38 = vld [vmem:[#allocation4 + $0x188] sm:$0xff] }
 0x1de   :  { %1566 = vmatpush.msra.mxu3 %v1487_v60 }
 0x1df   :  { %v1598_v15 = vadd.f32 -0.28449672, %v1347_v14  ;;  %v1118_v10 = vpop.f32.mrf.mxu1  ;;  %v1479_v14 = vld [vmem:[#allocation4 + $0x180] sm:$0xff] }
 0x1e0   :  { %v1119_v25 = vadd.f32 %v1118_v10, %v1099_v55  ;;  %v1138_v26 = vpop.f32.mrf.mxu2  ;;  %1567 = vmatpush.msra.mxu3 %v1486_v61 }
 0x1e1   :  { %v1355_v16 = vmul.f32 %v1598_v15, %v1312_v23 }
 0x1e2   :  { %v1139_v29 = vadd.f32 %v1138_v26, %v1119_v25  ;;  %1568 = vmatpush.msra.mxu3 %v1485_v62 }
 0x1e3   :  { %v1359_v44 = vadd.f32 0.2548296, %v1355_v16  ;;  %v1158_v37 = vpop.f32.mrf.mxu3 }
 0x1e4   :  { %v1159_v30 = vadd.f32 %v1158_v37, %v1139_v29  ;;  %1569 = vmatpush.msra.mxu3 %v1484_v58  ;;  %v1405_v29 = vperm.slane %v1905_v4, 3 }
 0x1e5   :  { %v1363_v49 = vmul.f32 %v1359_v44, %v1312_v23  ;;  %v1483_v23 = vld [vmem:[#allocation4 + $0x1a0] sm:$0xff] }
 0x1e6   :  { %1570 = vmatpush.msra.mxu3 %v1483_v23 }
 0x1e7   :  { %v1383_v45 = vmul.f32 %v1620_v11, %v1363_v49 }
 0x1e8   :  { %1571 = vmatpush.msra.mxu3 %v1482_v3 }
 0x1e9   :  { %v1387_v19 = vsub.f32 1.0, %v1383_v45 }
 0x1ea   :  { %1572 = vmatpush.msra.mxu3 %v1481_v9 }
 0x1eb   :  { %v1391_v50 = vmul.f32 %v1387_v19, %v1255_v59 }
 0x1ec   :  { %1573 = vmatpush.msra.mxu3 %v1480_v38 }
 0x1ed   :  { %v1395_v56 = vadd.f32 1.0, %v1391_v50 }
 0x1ee   :  { %1574 = vmatpush.msra.mxu3 %v1479_v14 }
 0x1ef   :  { %v1399_v24 = vmul.f32 %v1395_v56, %v1243_v20 }
 0x1f1   :  { %v1412_v1 = vmul.f32 %v1404_v22, %v1399_v24 }
 0x1f3   :  { %v1425_v31 = vadd.f32 %v1417_v27, %v1412_v1 }
 0x1f5   :  { %1429 = vst [vmem:[%s1996_s6 + $0x10] sm:$0xff] %v1425_v31  ;;  %1555 = vmatmul.f32.vlgmr.msra.gmra.mxu2 %v1425_v31 }
 0x203   :  { %v1178_v6 = vpop.f32.mrf.mxu0 }
 0x204   :  { %v1179_v41 = vadd.f32 %v1178_v6, %v1159_v30  ;;  %v1418_v30 = vperm.slane %v1913_v48, 3 }
 0x20a   :  { %v1198_v32 = vpop.f32.mrf.mxu1 }
 0x20b   :  { %v1199_v7 = vadd.f32 %v1198_v32, %v1179_v41  ;;  %v1218_v34 = vpop.f32.mrf.mxu2  ;;  %v1608_v41 = vld [vmem:[#allocation6] ss:$0 sm:$0xff] }
 0x20d   :  { %v1219_v35 = vadd.f32 %v1218_v34, %v1199_v7 }
 0x20f   :  { %v1238_v13 = vpop.f32.mrf.mxu3 }
 0x210   :  { %v1973_v40 = vadd.f32 %v1238_v13, %v1219_v35 }
 0x212   :  { %v1976_v43 = vmul.f32 0.70710677, %v1973_v40  ;;  %v1244_v27 = vmul.f32 0.5, %v1973_v40 }
 0x214   :  { %v1260_v47 = vand.u32 2147483647, %v1976_v43  ;;  %vm1252_vm3 = vcmp.lt.f32.partialorder %v1976_v43, 0.0 }
 0x215   :  { %v1256_v25 = vsel %vm1252_vm3, -1.0, %v1717_v5 }
 0x216   :  { %v1264_v52 = vmul.f32 0.3275911, %v1260_v47  ;;  %v1368_v44 = vsub.f32 0.0, %v1260_v47 }
 0x218   :  { %v1268_v54 = vadd.f32 1.0, %v1264_v52  ;;  %v1372_v45 = vmul.f32 %v1368_v44, %v1260_v47 }
 0x21a   :  { %1621 = vrcp.f32 %v1268_v54  ;;  %v1325_v2 = vand.u32 2147483648, %v1268_v54  ;;  %v1323_v28 = vand.u32 2147483647, %v1268_v54  ;;  %vm1319_vm0 = vweird.f32 %v1268_v54 }
 0x21b   :  { %v1379_v59 = vmul.f32 1.442695, %v1372_v45 }
 0x21c   :  { %v1326_v12 = vor.u32 1.1754944e-38, %v1325_v2  ;;  %vm1324_vm2 = vcmp.eq.f32.partialorder %v1323_v28, 8.507059e+37 }
 0x21d   :  { %1623 = vpow2.f32 %v1379_v59 }
 0x220   :  { %v1622_v21 = vpop.eup %1621 }
 0x221   :  { %v1315_v63 = vmul.f32 %v1622_v21, %v1268_v54  ;;  %vm1320_vm15 = vweird.f32 %v1622_v21 }
 0x222   :  { %vm1321_vm1 = vmor %vm1319_vm0, %vm1320_vm15 }
 0x223   :  { %v1316_v0 = vsub.f32 1.0, %v1315_v63  ;;  %v1624_v22 = vpop.eup %1623 }
 0x225   :  { %v1317_v8 = vmul.f32 %v1622_v21, %v1316_v0  ;;  %v1516_v32 = vpop.f32.mrf.mxu0 }
 0x226   :  { %v1517_v5 = vadd.f32 %v1608_v41, %v1516_v32 }
 0x227   :  { %v1318_v39 = vadd.f32 %v1622_v21, %v1317_v8 }
 0x229   :  { %v1322_v15 = vsel %vm1321_vm1, %v1622_v21, %v1318_v39 }
 0x22a   :  { %v1327_v16 = vsel %vm1324_vm2, %v1326_v12, %v1322_v15 }
 0x22b   :  { %v1332_v49 = vmul.f32 1.0614054, %v1327_v16 }
 0x22d   :  { %v1595_v11 = vadd.f32 -1.4531521, %v1332_v49 }
 0x22f   :  { %v1340_v17 = vmul.f32 %v1595_v11, %v1327_v16 }
 0x231   :  { %v1344_v19 = vadd.f32 1.4214138, %v1340_v17 }
 0x233   :  { %v1348_v50 = vmul.f32 %v1344_v19, %v1327_v16 }
 0x235   :  { %v1599_v51 = vadd.f32 -0.28449672, %v1348_v50 }
 0x236   :  { %v1536_v7 = vpop.f32.mrf.mxu1 }
 0x237   :  { %v1356_v55 = vmul.f32 %v1599_v51, %v1327_v16  ;;  %v1537_v34 = vadd.f32 %v1536_v7, %v1517_v5 }
 0x239   :  { %v1360_v20 = vadd.f32 0.2548296, %v1356_v55 }
 0x23b   :  { %v1364_v56 = vmul.f32 %v1360_v20, %v1327_v16 }
 0x23d   :  { %v1384_v10 = vmul.f32 %v1624_v22, %v1364_v56 }
 0x23f   :  { %v1388_v24 = vsub.f32 1.0, %v1384_v10 }
 0x241   :  { %v1392_v26 = vmul.f32 %v1388_v24, %v1256_v25 }
 0x243   :  { %v1396_v1 = vadd.f32 1.0, %v1392_v26 }
 0x245   :  { %v1400_v37 = vmul.f32 %v1396_v1, %v1244_v27 }
 0x247   :  { %v1413_v31 = vmul.f32 %v1405_v29, %v1400_v37 }
 0x249   :  { %v1426_v6 = vadd.f32 %v1418_v30, %v1413_v31 }
 0x24b   :  { %1430 = vst [vmem:[%s1996_s6 + $0x18] sm:$0xff] %v1426_v6  ;;  %1575 = vmatmul.f32.vlgmr.msra.gmra.mxu3 %v1426_v6 }
 0x278   :  { %v1556_v33 = vpop.f32.mrf.mxu2 }
 0x279   :  { %v1557_v35 = vadd.f32 %v1556_v33, %v1537_v34 }
 0x2ce   :  { %v1576_v36 = vpop.f32.mrf.mxu3 }
 0x2cf   :  { %v1577_v13 = vadd.f32 %v1576_v36, %v1557_v35 }
 0x2d1   :  { %1579 = vst [vmem:[%s1995_s5] sm:$0xff] %v1577_v13 }
 0x2d2   :  { %1588 = vsyncpa [#allocation3], 1 }
 0x2d3   :  { %1589 = vsyncpa [#allocation5], 1 }

</bundles_post_ra>
